<compile_context>
chip_gen: v7x
topology: tpu7x:2x2x1
jax: 0.10.0
libtpu: 0.0.40
codegen_flags: <defaults>
</compile_context>

<pallas_src>
import jax
import jax.numpy as jnp
from jax.experimental import pallas as pl
from jax.experimental.pallas import tpu as pltpu

G_PAD = 8       # padded number of graphs (sublane-friendly); real graphs sliced out
MIN_TILE = 16   # bf16 sublane tile; node-row tiles are multiples of this


def _round_up(x, m):
    return ((x + m - 1) // m) * m


def _pick_row_tile(n_pad):
    # For realistic N use 128-512 rows and size 2 * TM * N_PAD * 2B (double-buffered
    # bf16 A tile) against VMEM: v7x has 64 MiB physical (32 MiB default scoped) vs
    # 128 MiB on v5e/v6e.  The tiny demo uses 16 so the grid still has >1 tile.
    for t in (512, 256, 128, 16):
        if n_pad % t == 0 and n_pad >= 2 * t:
            return t
    return n_pad


def _full_spec(shape):
    nd = len(shape)
    return pl.BlockSpec(shape, lambda i: (0,) * nd)


# ----------------------- Kernel 1: fused GCN + ReLU + mask + TopK score -----------------------

def _gcn_topk_kernel(a_ref, ys_ref, yt_ref, dinv_ref, mask_ref, b_ref, ps_ref,
                     h_ref, s_ref):
    # A_hat @ (X W) for this row tile, expressed with dinv-scaled features:
    #   h_i = dinv_i * ( (A @ y_scaled)_i + y_scaled_i ) + b ,  y_scaled = dinv * (X @ W)
    agg = jnp.dot(a_ref[...], ys_ref[...], preferred_element_type=jnp.float32)  # bf16 MXU, f32 acc
    h = dinv_ref[...] * (agg + yt_ref[...].astype(jnp.float32)) + b_ref[...]
    h = jnp.maximum(h, 0.0) * mask_ref[...]
    h_ref[...] = h
    # TopKPooling score tanh(h . p / ||p||): VPU/XLU lane reduction (ps = p / ||p||).
    s_ref[...] = jnp.tanh(jnp.sum(h * ps_ref[...], axis=-1, keepdims=True))


def gcn_topk_layer(a_bf16, y_scaled, dinv, mask, b, p_scaled, tm):
    n_pad = a_bf16.shape[0]
    h_dim = y_scaled.shape[1]
    grid = (n_pad // tm,)
    return pl.pallas_call(
        _gcn_topk_kernel,
        grid=grid,
        in_specs=[
            pl.BlockSpec((tm, n_pad), lambda i: (i, 0)),      # A row tile (bf16)
            pl.BlockSpec((n_pad, h_dim), lambda i: (0, 0)),   # full y_scaled (bf16, fetched once)
            pl.BlockSpec((tm, h_dim), lambda i: (i, 0)),      # y_scaled tile (self-loop term)
            pl.BlockSpec((tm, 1), lambda i: (i, 0)),          # dinv tile
            pl.BlockSpec((tm, 1), lambda i: (i, 0)),          # mask tile
            pl.BlockSpec((1, h_dim), lambda i: (0, 0)),       # bias row
            pl.BlockSpec((1, h_dim), lambda i: (0, 0)),       # p / ||p|| row
        ],
        out_specs=[
            pl.BlockSpec((tm, h_dim), lambda i: (i, 0)),
            # TODO(synk): score output stays [N, 1] (narrow-lane store); for large N
            # emit it lane-dense as [1, N] once TM is a multiple of 128.
            pl.BlockSpec((tm, 1), lambda i: (i, 0)),
        ],
        out_shape=(jax.ShapeDtypeStruct((n_pad, h_dim), jnp.float32),
                   jax.ShapeDtypeStruct((n_pad, 1), jnp.float32)),
        compiler_params=pltpu.CompilerParams(dimension_semantics=("parallel",)),
    )(a_bf16, y_scaled, y_scaled, dinv.reshape(n_pad, 1), mask.reshape(n_pad, 1),
      b.reshape(1, h_dim), p_scaled)


# ------------- Kernel 2: fused pool-multiplier + GlobalAttention + residual + next XW -------------

def _pool_attn_kernel(h_ref, s_ref, keep_ref, oh_ref, gw_ref, gb_ref, out_prev_ref,
                      dinvn_ref, wn_ref, out_ref, yn_ref):
    keep = keep_ref[...]
    x = h_ref[...] * s_ref[...] * keep                     # x[perm] * tanh(score[perm])
    # GlobalAttention gate = Linear(x): lane reduction, kept in f32.
    gate = jnp.sum(x * gw_ref[...], axis=-1, keepdims=True) + gb_ref[...]     # [N, 1]
    active = (oh_ref[...] * keep) > 0.5                    # [N, G_PAD]
    neg = jnp.float32(-1e30)                               # f32 sentinel; softmax math stays f32
    g_bc = jnp.where(active, gate, neg)
    gmax = jnp.max(g_bc, axis=0, keepdims=True)
    e = jnp.where(active, jnp.exp(g_bc - gmax), 0.0)
    denom = jnp.maximum(jnp.sum(e, axis=0, keepdims=True), 1e-20)
    alpha = e * pl.reciprocal(denom, approx=True)          # [N, G_PAD]
    pooled = jax.lax.dot_general(
        alpha.astype(jnp.bfloat16), x.astype(jnp.bfloat16),
        (((0,), (0,)), ((), ())), preferred_element_type=jnp.float32)         # [G_PAD, H]
    out_ref[...] = out_prev_ref[...] + pooled              # residual accumulation in-kernel
    # Next layer's feature transform y_scaled = (dinv_next * x) @ W_next (bf16 MXU),
    # so XW never shows up as a separate pass between layers.
    xs = (dinvn_ref[...] * x).astype(jnp.bfloat16)
    yn_ref[...] = jnp.dot(xs, wn_ref[...],
                          preferred_element_type=jnp.float32).astype(jnp.bfloat16)


def pool_attn_layer(h, score, keep, onehot, gate_w_row, gate_b, out_prev,
                    dinv_next, w_next_bf16):
    # TODO(synk): single-block global reduction; for very large N this should be
    # row-tiled with an online-softmax accumulator (flash-style) in VMEM scratch.
    n_pad, h_dim = h.shape
    g_pad = onehot.shape[1]
    return pl.pallas_call(
        _pool_attn_kernel,
        grid=(1,),
        in_specs=[_full_spec((n_pad, h_dim)), _full_spec((n_pad, 1)),
                  _full_spec((n_pad, 1)), _full_spec((n_pad, g_pad)),
                  _full_spec((1, h_dim)), _full_spec((1, 1)),
                  _full_spec((g_pad, h_dim)), _full_spec((n_pad, 1)),
                  _full_spec((h_dim, h_dim))],
        out_specs=[_full_spec((g_pad, h_dim)), _full_spec((n_pad, h_dim))],
        out_shape=(jax.ShapeDtypeStruct((g_pad, h_dim), jnp.float32),
                   jax.ShapeDtypeStruct((n_pad, h_dim), jnp.bfloat16)),
        input_output_aliases={6: 0},        # accumulate the running 'out' in place
        compiler_params=pltpu.CompilerParams(dimension_semantics=("arbitrary",)),
    )(h, score, keep.reshape(n_pad, 1), onehot, gate_w_row, gate_b.reshape(1, 1),
      out_prev, dinv_next.reshape(n_pad, 1), w_next_bf16)


# ----------------------- Kernel 3: initial dinv-scaled feature transform -----------------------

def _feat_kernel(x_ref, dinv_ref, w_ref, y_ref):
    xs = (dinv_ref[...] * x_ref[...]).astype(jnp.bfloat16)
    y_ref[...] = jnp.dot(xs, w_ref[...],
                         preferred_element_type=jnp.float32).astype(jnp.bfloat16)


def feat_transform(x, dinv, w_bf16):
    n_pad, f_in = x.shape
    h_dim = w_bf16.shape[1]
    return pl.pallas_call(
        _feat_kernel,
        grid=(1,),
        in_specs=[_full_spec((n_pad, f_in)), _full_spec((n_pad, 1)),
                  _full_spec((f_in, h_dim))],
        out_specs=_full_spec((n_pad, h_dim)),
        out_shape=jax.ShapeDtypeStruct((n_pad, h_dim), jnp.bfloat16),
    )(x, dinv.reshape(n_pad, 1), w_bf16)


# ------------------------------- JAX glue (cheap, O(N) / O(E)) -------------------------------

def compute_dinv(src, dst, mask, n_pad):
    """rsqrt degree of the mask-induced subgraph (+ self loop); O(E), no N x N work."""
    nbr = jnp.zeros((n_pad,), jnp.float32).at[dst].add(mask[src])
    deg = mask * nbr + mask
    return jnp.where(deg > 0, jax.lax.rsqrt(deg), 0.0)


def topk_select(score, batch, mask, ratio, g_pad):
    """Per-graph TopK keep mask via one stable argsort (O(N log N)).

    Ties broken by lower node index, approximating PyG's stable descending sort.
    """
    n = score.shape[0]
    n_active = jnp.zeros((g_pad,), jnp.float32).at[batch].add(mask)
    k_per_graph = jnp.ceil(ratio * n_active).astype(jnp.int32)
    # key: ascending graph id, then descending score among active nodes, inactive last.
    key = batch.astype(jnp.float32) * 4.0 + jnp.where(mask > 0, (1.0 - score) * 0.5, 3.0)
    order = jnp.argsort(key)
    counts = jnp.zeros((g_pad,), jnp.int32).at[batch].add(1)
    starts = jnp.cumsum(counts) - counts
    pos = jnp.zeros((n,), jnp.int32).at[order].set(jnp.arange(n, dtype=jnp.int32))
    rank = pos - starts[batch]
    keep = (mask > 0) & (rank < k_per_graph[batch])
    return keep.astype(jnp.float32)


def forward(params, x_tokens, edge_index, batch, num_graphs,
            n_hidden_layers, ratio, pad_idx):
    assert num_graphs <= G_PAD
    n = x_tokens.shape[0]
    hidden = params['gcn_w'][0].shape[1]

    # Step 1: statement embedding.
    # TODO(synk): STEncoder's internal RNN is unspecified in the reference; approximated
    # by a masked mean-pool of token embeddings (XLA glue, not the hot path).
    emb = params['tok_emb'][x_tokens]                                  # [N, T, R]
    tok_mask = (x_tokens != pad_idx).astype(jnp.float32)               # [N, T]
    denom = jnp.maximum(tok_mask.sum(-1, keepdims=True), 1.0)
    node_emb = jnp.sum(emb * tok_mask[..., None], axis=1) / denom      # [N, R]

    # Pad the node axis to a multiple of the row tile; padded nodes are masked out.
    n_pad = _round_up(n, MIN_TILE)
    tm = _pick_row_tile(n_pad)
    node_emb = jnp.pad(node_emb, ((0, n_pad - n), (0, 0)))
    batch_p = jnp.concatenate([batch, jnp.full((n_pad - n,), G_PAD - 1, batch.dtype)])
    mask = jnp.concatenate([jnp.ones((n,), jnp.float32),
                            jnp.zeros((n_pad - n,), jnp.float32)])

    src, dst = edge_index[0], edge_index[1]
    # Dense adjacency built ONCE (no per-layer scatter rebuild); bf16 MXU operand.
    a_bf16 = (jnp.zeros((n_pad, n_pad), jnp.float32)
              .at[dst, src].add(1.0)).astype(jnp.bfloat16)
    onehot = (batch_p[:, None] ==
              jnp.arange(G_PAD, dtype=batch_p.dtype)[None, :]).astype(jnp.float32)

    gate_w_row = params['gate_w'].reshape(1, hidden)
    gate_b = params['gate_b']

    dinv = compute_dinv(src, dst, mask, n_pad)
    y = feat_transform(node_emb, dinv, params['gcn_w'][0].astype(jnp.bfloat16))

    out = jnp.zeros((G_PAD, hidden), jnp.float32)
    zeros_w = jnp.zeros((hidden, hidden), jnp.bfloat16)

    for i in range(n_hidden_layers):
        p = params['pool_p'][i]
        inv_norm = jax.lax.rsqrt(jnp.sum(p * p) + 1e-12)               # eps-guarded ||p||
        p_scaled = (p * inv_norm).reshape(1, hidden)

        # GCN + ReLU + mask + TopK score, fused and row-tiled.
        h, score = gcn_topk_layer(a_bf16, y, dinv, mask,
                                  params['gcn_b'][i], p_scaled, tm)

        # TopK node selection (cheap glue between the two kernels).
        keep = topk_select(score[:, 0], batch_p, mask, ratio, G_PAD)
        dinv_next = compute_dinv(src, dst, keep, n_pad)
        w_next = (params['gcn_w'][i + 1].astype(jnp.bfloat16)
                  if i + 1 < n_hidden_layers else zeros_w)

        # Pool multiplier + GlobalAttention + residual add + next layer's XW, fused.
        out, y = pool_attn_layer(h, score, keep, onehot, gate_w_row, gate_b,
                                 out, dinv_next, w_next)
        mask, dinv = keep, dinv_next

    return out[:num_graphs]


def init_params(key, vocab_size, rnn_hidden, hidden, n_hidden_layers):
    ks = iter(jax.random.split(key, 4 + 3 * n_hidden_layers))
    params = {'tok_emb': 0.1 * jax.random.normal(next(ks), (vocab_size, rnn_hidden),
                                                 jnp.float32)}
    gcn_w, gcn_b, pool_p = [], [], []
    f_in = rnn_hidden
    for _ in range(n_hidden_layers):
        gcn_w.append(0.2 * jax.random.normal(next(ks), (f_in, hidden), jnp.float32))
        gcn_b.append(0.05 * jax.random.normal(next(ks), (hidden,), jnp.float32))
        pool_p.append(jax.random.normal(next(ks), (hidden,), jnp.float32))
        f_in = hidden
    params['gcn_w'], params['gcn_b'], params['pool_p'] = gcn_w, gcn_b, pool_p
    params['gate_w'] = 0.2 * jax.random.normal(next(ks), (hidden, 1), jnp.float32)
    params['gate_b'] = jnp.zeros((1,), jnp.float32)
    return params


if __name__ == "__main__":
    NUM_GRAPHS = 2
    NODES_PER_GRAPH = 16
    N = NUM_GRAPHS * NODES_PER_GRAPH
    T = 8
    VOCAB = 64
    PAD_IDX = 0
    RNN_HIDDEN = 32
    HIDDEN = 32
    N_HIDDEN_LAYERS = 2   # one input layer + (n_hidden_layers - 1) hidden layers
    RATIO = 0.5

    key = jax.random.PRNGKey(0)
    k_tok, k_par = jax.random.split(key)

    # batched_graph.x : token ids per statement node, [N, T]
    x_tokens = jax.random.randint(k_tok, (N, T), 1, VOCAB, dtype=jnp.int32)
    rows = jnp.arange(N)[:, None]
    cols = jnp.arange(T)[None, :]
    x_tokens = jnp.where((rows % 2 == 1) & (cols >= 5), PAD_IDX, x_tokens)

    # batched_graph.batch : graph id per node
    batch = jnp.repeat(jnp.arange(NUM_GRAPHS, dtype=jnp.int32), NODES_PER_GRAPH)

    # batched_graph.edge_index : bidirectional ring within each graph, [2, E]
    src_list, dst_list = [], []
    for g in range(NUM_GRAPHS):
        base = g * NODES_PER_GRAPH
        for i in range(NODES_PER_GRAPH):
            a = base + i
            b = base + (i + 1) % NODES_PER_GRAPH
            src_list += [a, b]
            dst_list += [b, a]
    edge_index = jnp.array([src_list, dst_list], dtype=jnp.int32)

    params = init_params(k_par, VOCAB, RNN_HIDDEN, HIDDEN, N_HIDDEN_LAYERS)

    fwd = jax.jit(forward, static_argnums=(4, 5, 6, 7))
    out = fwd(params, x_tokens, edge_index, batch, NUM_GRAPHS,
              N_HIDDEN_LAYERS, RATIO, PAD_IDX)
    out = jax.block_until_ready(out)

    assert out.shape == (NUM_GRAPHS, HIDDEN), out.shape
    assert bool(jnp.all(jnp.isfinite(out)))
    print("KERNEL_OK")
</pallas_src>

<mosaic_0001>
module attributes {stable_mosaic.version = 11 : i64} {
  func.func private @main(%arg0: i32) attributes {dimension_semantics = [#tpu.dimension_semantics<core_parallel>], iteration_bounds = array<i64: 2>, tpu.core_type = #tpu.core_type<sc_scalar_subcore>, window_params = []} {
    return
  }
}

module attributes {stable_mosaic.version = 11 : i64} {
  func.func private @main(%arg0: i32) attributes {dimension_semantics = [#tpu.dimension_semantics<core_parallel>], iteration_bounds = array<i64: 2>, tpu.core_type = #tpu.core_type<sc_scalar_subcore>, window_params = []} {
    return
  }
}

module attributes {stable_mosaic.version = 11 : i64} {
  func.func @_feat_kernel(%arg0: i32, %arg1: memref<32x32xf32, #tpu.memory_space<vmem>>, %arg2: memref<32x1xf32, #tpu.memory_space<vmem>>, %arg3: memref<32x32xbf16, #tpu.memory_space<vmem>>, %arg4: memref<32x32xbf16, #tpu.memory_space<vmem>>) attributes {dimension_semantics = [#tpu.dimension_semantics<arbitrary>], iteration_bounds = array<i64: 1>, scalar_prefetch = 0 : i64, scratch_operands = 0 : i64, tpu.core_type = #tpu.core_type<tc>, window_params = [{pipeline_mode = #tpu.pipeline_mode<synchronous>, transform_indices = @transform_0, window_bounds = array<i64: 32, 32>}, {pipeline_mode = #tpu.pipeline_mode<synchronous>, transform_indices = @transform_1, window_bounds = array<i64: 32, 1>}, {pipeline_mode = #tpu.pipeline_mode<synchronous>, transform_indices = @transform_2, window_bounds = array<i64: 32, 32>}, {pipeline_mode = #tpu.pipeline_mode<synchronous>, transform_indices = @transform_3, window_bounds = array<i64: 32, 32>}]} {
    %c0 = arith.constant 0 : index
    %c0_0 = arith.constant 0 : index
    %0 = vector.load %arg2[%c0, %c0_0] : memref<32x1xf32, #tpu.memory_space<vmem>>, vector<32x1xf32>
    %c0_1 = arith.constant 0 : index
    %c0_2 = arith.constant 0 : index
    %1 = vector.load %arg1[%c0_1, %c0_2] : memref<32x32xf32, #tpu.memory_space<vmem>>, vector<32x32xf32>
    %2 = vector.broadcast %0 : vector<32x1xf32> to vector<32x32xf32>
    %3 = arith.mulf %2, %1 : vector<32x32xf32>
    %4 = arith.truncf %3 : vector<32x32xf32> to vector<32x32xbf16>
    %c0_3 = arith.constant 0 : index
    %c0_4 = arith.constant 0 : index
    %5 = vector.load %arg3[%c0_3, %c0_4] : memref<32x32xbf16, #tpu.memory_space<vmem>>, vector<32x32xbf16>
    %cst = arith.constant dense<0.000000e+00> : vector<32x32xf32>
    %6 = tpu.matmul %4, %5, %cst {dimension_numbers = #tpu.dot_dimension_numbers<[1], [0], [0], [1], [0, 0, 1, 1], [], []>} : vector<32x32xbf16>, vector<32x32xbf16>, vector<32x32xf32> -> vector<32x32xf32>
    %7 = arith.truncf %6 : vector<32x32xf32> to vector<32x32xbf16>
    %c0_5 = arith.constant 0 : index
    %c0_6 = arith.constant 0 : index
    %8 = vector.load %arg4[%c0_5, %c0_6] : memref<32x32xbf16, #tpu.memory_space<vmem>>, vector<32x32xbf16>
    tpu.vector_store %arg4[%c0_5, %c0_6], %7 {strides = array<i32>} : memref<32x32xbf16, #tpu.memory_space<vmem>>, vector<32x32xbf16>,
    return
  }
  func.func @transform_0(%arg0: i32) -> (i32, i32) {
    %c0_i32 = arith.constant 0 : i32
    %c0_i32_0 = arith.constant 0 : i32
    %c0_i32_1 = arith.constant 0 : i32
    return %c0_i32, %c0_i32_0 : i32, i32
  }
  func.func @transform_1(%arg0: i32) -> (i32, i32) {
    %c0_i32 = arith.constant 0 : i32
    %c0_i32_0 = arith.constant 0 : i32
    %c0_i32_1 = arith.constant 0 : i32
    return %c0_i32, %c0_i32_0 : i32, i32
  }
  func.func @transform_2(%arg0: i32) -> (i32, i32) {
    %c0_i32 = arith.constant 0 : i32
    %c0_i32_0 = arith.constant 0 : i32
    %c0_i32_1 = arith.constant 0 : i32
    return %c0_i32, %c0_i32_0 : i32, i32
  }
  func.func @transform_3(%arg0: i32) -> (i32, i32) {
    %c0_i32 = arith.constant 0 : i32
    %c0_i32_0 = arith.constant 0 : i32
    %c0_i32_1 = arith.constant 0 : i32
    return %c0_i32, %c0_i32_0 : i32, i32
  }
}

module attributes {stable_mosaic.version = 11 : i64} {
  func.func @_gcn_topk_kernel(%arg0: i32, %arg1: memref<16x32xbf16, #tpu.memory_space<vmem>>, %arg2: memref<32x32xbf16, #tpu.memory_space<vmem>>, %arg3: memref<16x32xbf16, #tpu.memory_space<vmem>>, %arg4: memref<16x1xf32, #tpu.memory_space<vmem>>, %arg5: memref<16x1xf32, #tpu.memory_space<vmem>>, %arg6: memref<1x32xf32, #tpu.memory_space<vmem>>, %arg7: memref<1x32xf32, #tpu.memory_space<vmem>>, %arg8: memref<16x32xf32, #tpu.memory_space<vmem>>, %arg9: memref<16x1xf32, #tpu.memory_space<vmem>>) attributes {dimension_semantics = [#tpu.dimension_semantics<parallel>], iteration_bounds = array<i64: 2>, scalar_prefetch = 0 : i64, scratch_operands = 0 : i64, tpu.core_type = #tpu.core_type<tc>, window_params = [{transform_indices = @transform_0, window_bounds = array<i64: 16, 32>}, {pipeline_mode = #tpu.pipeline_mode<synchronous>, transform_indices = @transform_1, window_bounds = array<i64: 32, 32>}, {transform_indices = @transform_2, window_bounds = array<i64: 16, 32>}, {transform_indices = @transform_3, window_bounds = array<i64: 16, 1>}, {transform_indices = @transform_4, window_bounds = array<i64: 16, 1>}, {pipeline_mode = #tpu.pipeline_mode<synchronous>, transform_indices = @transform_5, window_bounds = array<i64: 1, 32>}, {pipeline_mode = #tpu.pipeline_mode<synchronous>, transform_indices = @transform_6, window_bounds = array<i64: 1, 32>}, {transform_indices = @transform_7, window_bounds = array<i64: 16, 32>}, {transform_indices = @transform_8, window_bounds = array<i64: 16, 1>}]} {
    %c0 = arith.constant 0 : index
    %c0_0 = arith.constant 0 : index
    %0 = vector.load %arg1[%c0, %c0_0] : memref<16x32xbf16, #tpu.memory_space<vmem>>, vector<16x32xbf16>
    %c0_1 = arith.constant 0 : index
    %c0_2 = arith.constant 0 : index
    %1 = vector.load %arg2[%c0_1, %c0_2] : memref<32x32xbf16, #tpu.memory_space<vmem>>, vector<32x32xbf16>
    %cst = arith.constant dense<0.000000e+00> : vector<16x32xf32>
    %2 = tpu.matmul %0, %1, %cst {dimension_numbers = #tpu.dot_dimension_numbers<[1], [0], [0], [1], [0, 0, 1, 1], [], []>} : vector<16x32xbf16>, vector<32x32xbf16>, vector<16x32xf32> -> vector<16x32xf32>
    %c0_3 = arith.constant 0 : index
    %c0_4 = arith.constant 0 : index
    %3 = vector.load %arg4[%c0_3, %c0_4] : memref<16x1xf32, #tpu.memory_space<vmem>>, vector<16x1xf32>
    %c0_5 = arith.constant 0 : index
    %c0_6 = arith.constant 0 : index
    %4 = vector.load %arg3[%c0_5, %c0_6] : memref<16x32xbf16, #tpu.memory_space<vmem>>, vector<16x32xbf16>
    %5 = arith.extf %4 : vector<16x32xbf16> to vector<16x32xf32>
    %6 = arith.addf %2, %5 : vector<16x32xf32>
    %7 = vector.broadcast %3 : vector<16x1xf32> to vector<16x32xf32>
    %8 = arith.mulf %7, %6 : vector<16x32xf32>
    %c0_7 = arith.constant 0 : index
    %c0_8 = arith.constant 0 : index
    %9 = vector.load %arg6[%c0_7, %c0_8] : memref<1x32xf32, #tpu.memory_space<vmem>>, vector<1x32xf32>
    %10 = vector.broadcast %9 : vector<1x32xf32> to vector<16x32xf32>
    %11 = arith.addf %8, %10 : vector<16x32xf32>
    %cst_9 = arith.constant 0.000000e+00 : f32
    %12 = vector.broadcast %cst_9 : f32 to vector<16x32xf32>
    %13 = arith.maximumf %11, %12 : vector<16x32xf32>
    %c0_10 = arith.constant 0 : index
    %c0_11 = arith.constant 0 : index
    %14 = vector.load %arg5[%c0_10, %c0_11] : memref<16x1xf32, #tpu.memory_space<vmem>>, vector<16x1xf32>
    %15 = vector.broadcast %14 : vector<16x1xf32> to vector<16x32xf32>
    %16 = arith.mulf %13, %15 : vector<16x32xf32>
    %c0_12 = arith.constant 0 : index
    %c0_13 = arith.constant 0 : index
    %17 = vector.load %arg8[%c0_12, %c0_13] : memref<16x32xf32, #tpu.memory_space<vmem>>, vector<16x32xf32>
    tpu.vector_store %arg8[%c0_12, %c0_13], %16 {strides = array<i32>} : memref<16x32xf32, #tpu.memory_space<vmem>>, vector<16x32xf32>,
    %c0_14 = arith.constant 0 : index
    %c0_15 = arith.constant 0 : index
    %18 = vector.load %arg7[%c0_14, %c0_15] : memref<1x32xf32, #tpu.memory_space<vmem>>, vector<1x32xf32>
    %19 = vector.broadcast %18 : vector<1x32xf32> to vector<16x32xf32>
    %20 = arith.mulf %16, %19 : vector<16x32xf32>
    %cst_16 = arith.constant dense<0.000000e+00> : vector<16xf32>
    %21 = vector.multi_reduction <add>, %20, %cst_16 [1] : vector<16x32xf32> to vector<16xf32>
    %22 = vector.shape_cast %21 : vector<16xf32> to vector<16x1xf32>
    %23 = math.tanh %22 : vector<16x1xf32>
    %c0_17 = arith.constant 0 : index
    %c0_18 = arith.constant 0 : index
    %24 = vector.load %arg9[%c0_17, %c0_18] : memref<16x1xf32, #tpu.memory_space<vmem>>, vector<16x1xf32>
    tpu.vector_store %arg9[%c0_17, %c0_18], %23 {strides = array<i32>} : memref<16x1xf32, #tpu.memory_space<vmem>>, vector<16x1xf32>,
    return
  }
  func.func @transform_0(%arg0: i32) -> (i32, i32) {
    %c0_i32 = arith.constant 0 : i32
    %c0_i32_0 = arith.constant 0 : i32
    return %arg0, %c0_i32 : i32, i32
  }
  func.func @transform_1(%arg0: i32) -> (i32, i32) {
    %c0_i32 = arith.constant 0 : i32
    %c0_i32_0 = arith.constant 0 : i32
    %c0_i32_1 = arith.constant 0 : i32
    return %c0_i32, %c0_i32_0 : i32, i32
  }
  func.func @transform_2(%arg0: i32) -> (i32, i32) {
    %c0_i32 = arith.constant 0 : i32
    %c0_i32_0 = arith.constant 0 : i32
    return %arg0, %c0_i32 : i32, i32
  }
  func.func @transform_3(%arg0: i32) -> (i32, i32) {
    %c0_i32 = arith.constant 0 : i32
    %c0_i32_0 = arith.constant 0 : i32
    return %arg0, %c0_i32 : i32, i32
  }
  func.func @transform_4(%arg0: i32) -> (i32, i32) {
    %c0_i32 = arith.constant 0 : i32
    %c0_i32_0 = arith.constant 0 : i32
    return %arg0, %c0_i32 : i32, i32
  }
  func.func @transform_5(%arg0: i32) -> (i32, i32) {
    %c0_i32 = arith.constant 0 : i32
    %c0_i32_0 = arith.constant 0 : i32
    %c0_i32_1 = arith.constant 0 : i32
    return %c0_i32, %c0_i32_0 : i32, i32
  }
  func.func @transform_6(%arg0: i32) -> (i32, i32) {
    %c0_i32 = arith.constant 0 : i32
    %c0_i32_0 = arith.constant 0 : i32
    %c0_i32_1 = arith.constant 0 : i32
    return %c0_i32, %c0_i32_0 : i32, i32
  }
  func.func @transform_7(%arg0: i32) -> (i32, i32) {
    %c0_i32 = arith.constant 0 : i32
    %c0_i32_0 = arith.constant 0 : i32
    return %arg0, %c0_i32 : i32, i32
  }
  func.func @transform_8(%arg0: i32) -> (i32, i32) {
    %c0_i32 = arith.constant 0 : i32
    %c0_i32_0 = arith.constant 0 : i32
    return %arg0, %c0_i32 : i32, i32
  }
}

module attributes {stable_mosaic.version = 11 : i64} {
  func.func @_pool_attn_kernel(%arg0: i32, %arg1: memref<32x32xf32, #tpu.memory_space<vmem>>, %arg2: memref<32x1xf32, #tpu.memory_space<vmem>>, %arg3: memref<32x1xf32, #tpu.memory_space<vmem>>, %arg4: memref<32x8xf32, #tpu.memory_space<vmem>>, %arg5: memref<1x32xf32, #tpu.memory_space<vmem>>, %arg6: memref<1x1xf32, #tpu.memory_space<vmem>>, %arg7: memref<8x32xf32, #tpu.memory_space<vmem>>, %arg8: memref<32x1xf32, #tpu.memory_space<vmem>>, %arg9: memref<32x32xbf16, #tpu.memory_space<vmem>>, %arg10: memref<8x32xf32, #tpu.memory_space<vmem>>, %arg11: memref<32x32xbf16, #tpu.memory_space<vmem>>) attributes {dimension_semantics = [#tpu.dimension_semantics<arbitrary>], iteration_bounds = array<i64: 1>, scalar_prefetch = 0 : i64, scratch_operands = 0 : i64, tpu.core_type = #tpu.core_type<tc>, window_params = [{pipeline_mode = #tpu.pipeline_mode<synchronous>, transform_indices = @transform_0, window_bounds = array<i64: 32, 32>}, {pipeline_mode = #tpu.pipeline_mode<synchronous>, transform_indices = @transform_1, window_bounds = array<i64: 32, 1>}, {pipeline_mode = #tpu.pipeline_mode<synchronous>, transform_indices = @transform_2, window_bounds = array<i64: 32, 1>}, {pipeline_mode = #tpu.pipeline_mode<synchronous>, transform_indices = @transform_3, window_bounds = array<i64: 32, 8>}, {pipeline_mode = #tpu.pipeline_mode<synchronous>, transform_indices = @transform_4, window_bounds = array<i64: 1, 32>}, {pipeline_mode = #tpu.pipeline_mode<synchronous>, transform_indices = @transform_5, window_bounds = array<i64: 1, 1>}, {pipeline_mode = #tpu.pipeline_mode<synchronous>, transform_indices = @transform_6, window_bounds = array<i64: 8, 32>}, {pipeline_mode = #tpu.pipeline_mode<synchronous>, transform_indices = @transform_7, window_bounds = array<i64: 32, 1>}, {pipeline_mode = #tpu.pipeline_mode<synchronous>, transform_indices = @transform_8, window_bounds = array<i64: 32, 32>}, {pipeline_mode = #tpu.pipeline_mode<synchronous>, transform_indices = @transform_9, window_bounds = array<i64: 8, 32>}, {pipeline_mode = #tpu.pipeline_mode<synchronous>, transform_indices = @transform_10, window_bounds = array<i64: 32, 32>}]} {
    %c0 = arith.constant 0 : index
    %c0_0 = arith.constant 0 : index
    %0 = vector.load %arg3[%c0, %c0_0] : memref<32x1xf32, #tpu.memory_space<vmem>>, vector<32x1xf32>
    %c0_1 = arith.constant 0 : index
    %c0_2 = arith.constant 0 : index
    %1 = vector.load %arg1[%c0_1, %c0_2] : memref<32x32xf32, #tpu.memory_space<vmem>>, vector<32x32xf32>
    %c0_3 = arith.constant 0 : index
    %c0_4 = arith.constant 0 : index
    %2 = vector.load %arg2[%c0_3, %c0_4] : memref<32x1xf32, #tpu.memory_space<vmem>>, vector<32x1xf32>
    %3 = vector.broadcast %2 : vector<32x1xf32> to vector<32x32xf32>
    %4 = arith.mulf %1, %3 : vector<32x32xf32>
    %5 = vector.broadcast %0 : vector<32x1xf32> to vector<32x32xf32>
    %6 = arith.mulf %4, %5 : vector<32x32xf32>
    %c0_5 = arith.constant 0 : index
    %c0_6 = arith.constant 0 : index
    %7 = vector.load %arg5[%c0_5, %c0_6] : memref<1x32xf32, #tpu.memory_space<vmem>>, vector<1x32xf32>
    %8 = vector.broadcast %7 : vector<1x32xf32> to vector<32x32xf32>
    %9 = arith.mulf %6, %8 : vector<32x32xf32>
    %cst = arith.constant dense<0.000000e+00> : vector<32xf32>
    %10 = vector.multi_reduction <add>, %9, %cst [1] : vector<32x32xf32> to vector<32xf32>
    %11 = vector.shape_cast %10 : vector<32xf32> to vector<32x1xf32>
    %c0_7 = arith.constant 0 : index
    %c0_8 = arith.constant 0 : index
    %12 = vector.load %arg6[%c0_7, %c0_8] : memref<1x1xf32, #tpu.memory_space<vmem>>, vector<1x1xf32>
    %13 = vector.broadcast %12 : vector<1x1xf32> to vector<32x1xf32>
    %14 = arith.addf %11, %13 : vector<32x1xf32>
    %c0_9 = arith.constant 0 : index
    %c0_10 = arith.constant 0 : index
    %15 = vector.load %arg4[%c0_9, %c0_10] : memref<32x8xf32, #tpu.memory_space<vmem>>, vector<32x8xf32>
    %16 = vector.broadcast %0 : vector<32x1xf32> to vector<32x8xf32>
    %17 = arith.mulf %15, %16 : vector<32x8xf32>
    %cst_11 = arith.constant 5.000000e-01 : f32
    %18 = vector.broadcast %cst_11 : f32 to vector<32x8xf32>
    %19 = arith.cmpf ogt, %17, %18 : vector<32x8xf32>
    %cst_12 = arith.constant -1.000000e+30 : f32
    %20 = vector.shape_cast %14 : vector<32x1xf32> to vector<32x1xf32>
    %21 = vector.broadcast %20 : vector<32x1xf32> to vector<32x8xf32>
    %22 = vector.broadcast %cst_12 : f32 to vector<32x8xf32>
    %23 = arith.select %19, %21, %22 : vector<32x8xi1>, vector<32x8xf32>
    %cst_13 = arith.constant dense<0xFF800000> : vector<8xf32>
    %24 = vector.multi_reduction <maximumf>, %23, %cst_13 [0] : vector<32x8xf32> to vector<8xf32>
    %25 = vector.shape_cast %24 : vector<8xf32> to vector<1x8xf32>
    %26 = vector.broadcast %25 : vector<1x8xf32> to vector<32x8xf32>
    %27 = arith.subf %23, %26 : vector<32x8xf32>
    %28 = math.exp %27 : vector<32x8xf32>
    %cst_14 = arith.constant 0.000000e+00 : f32
    %29 = vector.broadcast %cst_14 : f32 to vector<32x8xf32>
    %30 = arith.select %19, %28, %29 : vector<32x8xi1>, vector<32x8xf32>
    %cst_15 = arith.constant dense<0.000000e+00> : vector<8xf32>
    %31 = vector.multi_reduction <add>, %30, %cst_15 [0] : vector<32x8xf32> to vector<8xf32>
    %32 = vector.shape_cast %31 : vector<8xf32> to vector<1x8xf32>
    %cst_16 = arith.constant 9.99999968E-21 : f32
    %33 = vector.broadcast %cst_16 : f32 to vector<1x8xf32>
    %34 = arith.maximumf %32, %33 : vector<1x8xf32>
    %35 = tpu.reciprocal %34 {approx = true} : vector<1x8xf32> -> vector<1x8xf32>
    %36 = vector.broadcast %35 : vector<1x8xf32> to vector<32x8xf32>
    %37 = arith.mulf %30, %36 : vector<32x8xf32>
    %38 = arith.truncf %37 : vector<32x8xf32> to vector<32x8xbf16>
    %39 = arith.truncf %6 : vector<32x32xf32> to vector<32x32xbf16>
    %cst_17 = arith.constant dense<0.000000e+00> : vector<8x32xf32>
    %40 = tpu.matmul %38, %39, %cst_17 {dimension_numbers = #tpu.dot_dimension_numbers<[0], [0], [1], [1], [0, 1, 1, 1], [], []>} : vector<32x8xbf16>, vector<32x32xbf16>, vector<8x32xf32> -> vector<8x32xf32>
    %c0_18 = arith.constant 0 : index
    %c0_19 = arith.constant 0 : index
    %41 = vector.load %arg7[%c0_18, %c0_19] : memref<8x32xf32, #tpu.memory_space<vmem>>, vector<8x32xf32>
    %42 = arith.addf %41, %40 : vector<8x32xf32>
    %c0_20 = arith.constant 0 : index
    %c0_21 = arith.constant 0 : index
    %43 = vector.load %arg10[%c0_20, %c0_21] : memref<8x32xf32, #tpu.memory_space<vmem>>, vector<8x32xf32>
    tpu.vector_store %arg10[%c0_20, %c0_21], %42 {strides = array<i32>} : memref<8x32xf32, #tpu.memory_space<vmem>>, vector<8x32xf32>,
    %c0_22 = arith.constant 0 : index
    %c0_23 = arith.constant 0 : index
    %44 = vector.load %arg8[%c0_22, %c0_23] : memref<32x1xf32, #tpu.memory_space<vmem>>, vector<32x1xf32>
    %45 = vector.broadcast %44 : vector<32x1xf32> to vector<32x32xf32>
    %46 = arith.mulf %45, %6 : vector<32x32xf32>
    %47 = arith.truncf %46 : vector<32x32xf32> to vector<32x32xbf16>
    %c0_24 = arith.constant 0 : index
    %c0_25 = arith.constant 0 : index
    %48 = vector.load %arg9[%c0_24, %c0_25] : memref<32x32xbf16, #tpu.memory_space<vmem>>, vector<32x32xbf16>
    %cst_26 = arith.constant dense<0.000000e+00> : vector<32x32xf32>
    %49 = tpu.matmul %47, %48, %cst_26 {dimension_numbers = #tpu.dot_dimension_numbers<[1], [0], [0], [1], [0, 0, 1, 1], [], []>} : vector<32x32xbf16>, vector<32x32xbf16>, vector<32x32xf32> -> vector<32x32xf32>
    %50 = arith.truncf %49 : vector<32x32xf32> to vector<32x32xbf16>
    %c0_27 = arith.constant 0 : index
    %c0_28 = arith.constant 0 : index
    %51 = vector.load %arg11[%c0_27, %c0_28] : memref<32x32xbf16, #tpu.memory_space<vmem>>, vector<32x32xbf16>
    tpu.vector_store %arg11[%c0_27, %c0_28], %50 {strides = array<i32>} : memref<32x32xbf16, #tpu.memory_space<vmem>>, vector<32x32xbf16>,
    return
  }
  func.func @transform_0(%arg0: i32) -> (i32, i32) {
    %c0_i32 = arith.constant 0 : i32
    %c0_i32_0 = arith.constant 0 : i32
    %c0_i32_1 = arith.constant 0 : i32
    return %c0_i32, %c0_i32_0 : i32, i32
  }
  func.func @transform_1(%arg0: i32) -> (i32, i32) {
    %c0_i32 = arith.constant 0 : i32
    %c0_i32_0 = arith.constant 0 : i32
    %c0_i32_1 = arith.constant 0 : i32
    return %c0_i32, %c0_i32_0 : i32, i32
  }
  func.func @transform_2(%arg0: i32) -> (i32, i32) {
    %c0_i32 = arith.constant 0 : i32
    %c0_i32_0 = arith.constant 0 : i32
    %c0_i32_1 = arith.constant 0 : i32
    return %c0_i32, %c0_i32_0 : i32, i32
  }
  func.func @transform_3(%arg0: i32) -> (i32, i32) {
    %c0_i32 = arith.constant 0 : i32
    %c0_i32_0 = arith.constant 0 : i32
    %c0_i32_1 = arith.constant 0 : i32
    return %c0_i32, %c0_i32_0 : i32, i32
  }
  func.func @transform_4(%arg0: i32) -> (i32, i32) {
    %c0_i32 = arith.constant 0 : i32
    %c0_i32_0 = arith.constant 0 : i32
    %c0_i32_1 = arith.constant 0 : i32
    return %c0_i32, %c0_i32_0 : i32, i32
  }
  func.func @transform_5(%arg0: i32) -> (i32, i32) {
    %c0_i32 = arith.constant 0 : i32
    %c0_i32_0 = arith.constant 0 : i32
    %c0_i32_1 = arith.constant 0 : i32
    return %c0_i32, %c0_i32_0 : i32, i32
  }
  func.func @transform_6(%arg0: i32) -> (i32, i32) {
    %c0_i32 = arith.constant 0 : i32
    %c0_i32_0 = arith.constant 0 : i32
    %c0_i32_1 = arith.constant 0 : i32
    return %c0_i32, %c0_i32_0 : i32, i32
  }
  func.func @transform_7(%arg0: i32) -> (i32, i32) {
    %c0_i32 = arith.constant 0 : i32
    %c0_i32_0 = arith.constant 0 : i32
    %c0_i32_1 = arith.constant 0 : i32
    return %c0_i32, %c0_i32_0 : i32, i32
  }
  func.func @transform_8(%arg0: i32) -> (i32, i32) {
    %c0_i32 = arith.constant 0 : i32
    %c0_i32_0 = arith.constant 0 : i32
    %c0_i32_1 = arith.constant 0 : i32
    return %c0_i32, %c0_i32_0 : i32, i32
  }
  func.func @transform_9(%arg0: i32) -> (i32, i32) {
    %c0_i32 = arith.constant 0 : i32
    %c0_i32_0 = arith.constant 0 : i32
    %c0_i32_1 = arith.constant 0 : i32
    return %c0_i32, %c0_i32_0 : i32, i32
  }
  func.func @transform_10(%arg0: i32) -> (i32, i32) {
    %c0_i32 = arith.constant 0 : i32
    %c0_i32_0 = arith.constant 0 : i32
    %c0_i32_1 = arith.constant 0 : i32
    return %c0_i32, %c0_i32_0 : i32, i32
  }
}

module attributes {stable_mosaic.version = 11 : i64} {
  func.func @_pool_attn_kernel(%arg0: i32, %arg1: memref<32x32xf32, #tpu.memory_space<vmem>>, %arg2: memref<32x1xf32, #tpu.memory_space<vmem>>, %arg3: memref<32x1xf32, #tpu.memory_space<vmem>>, %arg4: memref<32x8xf32, #tpu.memory_space<vmem>>, %arg5: memref<1x32xf32, #tpu.memory_space<vmem>>, %arg6: memref<1x1xf32, #tpu.memory_space<vmem>>, %arg7: memref<8x32xf32, #tpu.memory_space<vmem>>, %arg8: memref<32x1xf32, #tpu.memory_space<vmem>>, %arg9: memref<32x32xbf16, #tpu.memory_space<vmem>>, %arg10: memref<8x32xf32, #tpu.memory_space<vmem>>, %arg11: memref<32x32xbf16, #tpu.memory_space<vmem>>) attributes {dimension_semantics = [#tpu.dimension_semantics<arbitrary>], iteration_bounds = array<i64: 1>, scalar_prefetch = 0 : i64, scratch_operands = 0 : i64, tpu.core_type = #tpu.core_type<tc>, window_params = [{pipeline_mode = #tpu.pipeline_mode<synchronous>, transform_indices = @transform_0, window_bounds = array<i64: 32, 32>}, {pipeline_mode = #tpu.pipeline_mode<synchronous>, transform_indices = @transform_1, window_bounds = array<i64: 32, 1>}, {pipeline_mode = #tpu.pipeline_mode<synchronous>, transform_indices = @transform_2, window_bounds = array<i64: 32, 1>}, {pipeline_mode = #tpu.pipeline_mode<synchronous>, transform_indices = @transform_3, window_bounds = array<i64: 32, 8>}, {pipeline_mode = #tpu.pipeline_mode<synchronous>, transform_indices = @transform_4, window_bounds = array<i64: 1, 32>}, {pipeline_mode = #tpu.pipeline_mode<synchronous>, transform_indices = @transform_5, window_bounds = array<i64: 1, 1>}, {pipeline_mode = #tpu.pipeline_mode<synchronous>, transform_indices = @transform_6, window_bounds = array<i64: 8, 32>}, {pipeline_mode = #tpu.pipeline_mode<synchronous>, transform_indices = @transform_7, window_bounds = array<i64: 32, 1>}, {pipeline_mode = #tpu.pipeline_mode<synchronous>, transform_indices = @transform_8, window_bounds = array<i64: 32, 32>}, {pipeline_mode = #tpu.pipeline_mode<synchronous>, transform_indices = @transform_9, window_bounds = array<i64: 8, 32>}, {pipeline_mode = #tpu.pipeline_mode<synchronous>, transform_indices = @transform_10, window_bounds = array<i64: 32, 32>}]} {
    %c0 = arith.constant 0 : index
    %c0_0 = arith.constant 0 : index
    %0 = vector.load %arg3[%c0, %c0_0] : memref<32x1xf32, #tpu.memory_space<vmem>>, vector<32x1xf32>
    %c0_1 = arith.constant 0 : index
    %c0_2 = arith.constant 0 : index
    %1 = vector.load %arg1[%c0_1, %c0_2] : memref<32x32xf32, #tpu.memory_space<vmem>>, vector<32x32xf32>
    %c0_3 = arith.constant 0 : index
    %c0_4 = arith.constant 0 : index
    %2 = vector.load %arg2[%c0_3, %c0_4] : memref<32x1xf32, #tpu.memory_space<vmem>>, vector<32x1xf32>
    %3 = vector.broadcast %2 : vector<32x1xf32> to vector<32x32xf32>
    %4 = arith.mulf %1, %3 : vector<32x32xf32>
    %5 = vector.broadcast %0 : vector<32x1xf32> to vector<32x32xf32>
    %6 = arith.mulf %4, %5 : vector<32x32xf32>
    %c0_5 = arith.constant 0 : index
    %c0_6 = arith.constant 0 : index
    %7 = vector.load %arg5[%c0_5, %c0_6] : memref<1x32xf32, #tpu.memory_space<vmem>>, vector<1x32xf32>
    %8 = vector.broadcast %7 : vector<1x32xf32> to vector<32x32xf32>
    %9 = arith.mulf %6, %8 : vector<32x32xf32>
    %cst = arith.constant dense<0.000000e+00> : vector<32xf32>
    %10 = vector.multi_reduction <add>, %9, %cst [1] : vector<32x32xf32> to vector<32xf32>
    %11 = vector.shape_cast %10 : vector<32xf32> to vector<32x1xf32>
    %c0_7 = arith.constant 0 : index
    %c0_8 = arith.constant 0 : index
    %12 = vector.load %arg6[%c0_7, %c0_8] : memref<1x1xf32, #tpu.memory_space<vmem>>, vector<1x1xf32>
    %13 = vector.broadcast %12 : vector<1x1xf32> to vector<32x1xf32>
    %14 = arith.addf %11, %13 : vector<32x1xf32>
    %c0_9 = arith.constant 0 : index
    %c0_10 = arith.constant 0 : index
    %15 = vector.load %arg4[%c0_9, %c0_10] : memref<32x8xf32, #tpu.memory_space<vmem>>, vector<32x8xf32>
    %16 = vector.broadcast %0 : vector<32x1xf32> to vector<32x8xf32>
    %17 = arith.mulf %15, %16 : vector<32x8xf32>
    %cst_11 = arith.constant 5.000000e-01 : f32
    %18 = vector.broadcast %cst_11 : f32 to vector<32x8xf32>
    %19 = arith.cmpf ogt, %17, %18 : vector<32x8xf32>
    %cst_12 = arith.constant -1.000000e+30 : f32
    %20 = vector.shape_cast %14 : vector<32x1xf32> to vector<32x1xf32>
    %21 = vector.broadcast %20 : vector<32x1xf32> to vector<32x8xf32>
    %22 = vector.broadcast %cst_12 : f32 to vector<32x8xf32>
    %23 = arith.select %19, %21, %22 : vector<32x8xi1>, vector<32x8xf32>
    %cst_13 = arith.constant dense<0xFF800000> : vector<8xf32>
    %24 = vector.multi_reduction <maximumf>, %23, %cst_13 [0] : vector<32x8xf32> to vector<8xf32>
    %25 = vector.shape_cast %24 : vector<8xf32> to vector<1x8xf32>
    %26 = vector.broadcast %25 : vector<1x8xf32> to vector<32x8xf32>
    %27 = arith.subf %23, %26 : vector<32x8xf32>
    %28 = math.exp %27 : vector<32x8xf32>
    %cst_14 = arith.constant 0.000000e+00 : f32
    %29 = vector.broadcast %cst_14 : f32 to vector<32x8xf32>
    %30 = arith.select %19, %28, %29 : vector<32x8xi1>, vector<32x8xf32>
    %cst_15 = arith.constant dense<0.000000e+00> : vector<8xf32>
    %31 = vector.multi_reduction <add>, %30, %cst_15 [0] : vector<32x8xf32> to vector<8xf32>
    %32 = vector.shape_cast %31 : vector<8xf32> to vector<1x8xf32>
    %cst_16 = arith.constant 9.99999968E-21 : f32
    %33 = vector.broadcast %cst_16 : f32 to vector<1x8xf32>
    %34 = arith.maximumf %32, %33 : vector<1x8xf32>
    %35 = tpu.reciprocal %34 {approx = true} : vector<1x8xf32> -> vector<1x8xf32>
    %36 = vector.broadcast %35 : vector<1x8xf32> to vector<32x8xf32>
    %37 = arith.mulf %30, %36 : vector<32x8xf32>
    %38 = arith.truncf %37 : vector<32x8xf32> to vector<32x8xbf16>
    %39 = arith.truncf %6 : vector<32x32xf32> to vector<32x32xbf16>
    %cst_17 = arith.constant dense<0.000000e+00> : vector<8x32xf32>
    %40 = tpu.matmul %38, %39, %cst_17 {dimension_numbers = #tpu.dot_dimension_numbers<[0], [0], [1], [1], [0, 1, 1, 1], [], []>} : vector<32x8xbf16>, vector<32x32xbf16>, vector<8x32xf32> -> vector<8x32xf32>
    %c0_18 = arith.constant 0 : index
    %c0_19 = arith.constant 0 : index
    %41 = vector.load %arg7[%c0_18, %c0_19] : memref<8x32xf32, #tpu.memory_space<vmem>>, vector<8x32xf32>
    %42 = arith.addf %41, %40 : vector<8x32xf32>
    %c0_20 = arith.constant 0 : index
    %c0_21 = arith.constant 0 : index
    %43 = vector.load %arg10[%c0_20, %c0_21] : memref<8x32xf32, #tpu.memory_space<vmem>>, vector<8x32xf32>
    tpu.vector_store %arg10[%c0_20, %c0_21], %42 {strides = array<i32>} : memref<8x32xf32, #tpu.memory_space<vmem>>, vector<8x32xf32>,
    %c0_22 = arith.constant 0 : index
    %c0_23 = arith.constant 0 : index
    %44 = vector.load %arg8[%c0_22, %c0_23] : memref<32x1xf32, #tpu.memory_space<vmem>>, vector<32x1xf32>
    %45 = vector.broadcast %44 : vector<32x1xf32> to vector<32x32xf32>
    %46 = arith.mulf %45, %6 : vector<32x32xf32>
    %47 = arith.truncf %46 : vector<32x32xf32> to vector<32x32xbf16>
    %c0_24 = arith.constant 0 : index
    %c0_25 = arith.constant 0 : index
    %48 = vector.load %arg9[%c0_24, %c0_25] : memref<32x32xbf16, #tpu.memory_space<vmem>>, vector<32x32xbf16>
    %cst_26 = arith.constant dense<0.000000e+00> : vector<32x32xf32>
    %49 = tpu.matmul %47, %48, %cst_26 {dimension_numbers = #tpu.dot_dimension_numbers<[1], [0], [0], [1], [0, 0, 1, 1], [], []>} : vector<32x32xbf16>, vector<32x32xbf16>, vector<32x32xf32> -> vector<32x32xf32>
    %50 = arith.truncf %49 : vector<32x32xf32> to vector<32x32xbf16>
    %c0_27 = arith.constant 0 : index
    %c0_28 = arith.constant 0 : index
    %51 = vector.load %arg11[%c0_27, %c0_28] : memref<32x32xbf16, #tpu.memory_space<vmem>>, vector<32x32xbf16>
    tpu.vector_store %arg11[%c0_27, %c0_28], %50 {strides = array<i32>} : memref<32x32xbf16, #tpu.memory_space<vmem>>, vector<32x32xbf16>,
    return
  }
  func.func @transform_0(%arg0: i32) -> (i32, i32) {
    %c0_i32 = arith.constant 0 : i32
    %c0_i32_0 = arith.constant 0 : i32
    %c0_i32_1 = arith.constant 0 : i32
    return %c0_i32, %c0_i32_0 : i32, i32
  }
  func.func @transform_1(%arg0: i32) -> (i32, i32) {
    %c0_i32 = arith.constant 0 : i32
    %c0_i32_0 = arith.constant 0 : i32
    %c0_i32_1 = arith.constant 0 : i32
    return %c0_i32, %c0_i32_0 : i32, i32
  }
  func.func @transform_2(%arg0: i32) -> (i32, i32) {
    %c0_i32 = arith.constant 0 : i32
    %c0_i32_0 = arith.constant 0 : i32
    %c0_i32_1 = arith.constant 0 : i32
    return %c0_i32, %c0_i32_0 : i32, i32
  }
  func.func @transform_3(%arg0: i32) -> (i32, i32) {
    %c0_i32 = arith.constant 0 : i32
    %c0_i32_0 = arith.constant 0 : i32
    %c0_i32_1 = arith.constant 0 : i32
    return %c0_i32, %c0_i32_0 : i32, i32
  }
  func.func @transform_4(%arg0: i32) -> (i32, i32) {
    %c0_i32 = arith.constant 0 : i32
    %c0_i32_0 = arith.constant 0 : i32
    %c0_i32_1 = arith.constant 0 : i32
    return %c0_i32, %c0_i32_0 : i32, i32
  }
  func.func @transform_5(%arg0: i32) -> (i32, i32) {
    %c0_i32 = arith.constant 0 : i32
    %c0_i32_0 = arith.constant 0 : i32
    %c0_i32_1 = arith.constant 0 : i32
    return %c0_i32, %c0_i32_0 : i32, i32
  }
  func.func @transform_6(%arg0: i32) -> (i32, i32) {
    %c0_i32 = arith.constant 0 : i32
    %c0_i32_0 = arith.constant 0 : i32
    %c0_i32_1 = arith.constant 0 : i32
    return %c0_i32, %c0_i32_0 : i32, i32
  }
  func.func @transform_7(%arg0: i32) -> (i32, i32) {
    %c0_i32 = arith.constant 0 : i32
    %c0_i32_0 = arith.constant 0 : i32
    %c0_i32_1 = arith.constant 0 : i32
    return %c0_i32, %c0_i32_0 : i32, i32
  }
  func.func @transform_8(%arg0: i32) -> (i32, i32) {
    %c0_i32 = arith.constant 0 : i32
    %c0_i32_0 = arith.constant 0 : i32
    %c0_i32_1 = arith.constant 0 : i32
    return %c0_i32, %c0_i32_0 : i32, i32
  }
  func.func @transform_9(%arg0: i32) -> (i32, i32) {
    %c0_i32 = arith.constant 0 : i32
    %c0_i32_0 = arith.constant 0 : i32
    %c0_i32_1 = arith.constant 0 : i32
    return %c0_i32, %c0_i32_0 : i32, i32
  }
  func.func @transform_10(%arg0: i32) -> (i32, i32) {
    %c0_i32 = arith.constant 0 : i32
    %c0_i32_0 = arith.constant 0 : i32
    %c0_i32_1 = arith.constant 0 : i32
    return %c0_i32, %c0_i32_0 : i32, i32
  }
}

</mosaic_0001>

<bundles_post_ra>
// kernel: forward.5
= control target key start
LH: loop header
LB: loop body
LE: loop exit
PB: predicated region body
PF: predicated region fallthrough
CT: control target
= control target key end

     0   :  { %v175_v0 = vmov 0   ;;  %vm65_vm0 = vcmask 261120   ;;  %vm137_vm1 = vcmask 257024   ;;  %s238_s1 = inlined_call_operand.vmem [shape: f32[32,1], index: 1, kind: input, shape index: {}]   ;;  %s239_s2 = inlined_call_operand.vmem [shape: bf16[32,32], index: 2, kind: input, shape index: {}]   ;;  %s240_s0 = inlined_call_operand.vmem [shape: f32[32,32], index: 0, kind: input, shape index: {}]   ;;  %s241_s3 = inlined_call_operand.vmem [shape: bf16[32,32], index: 3, kind: output, shape index: {}]  }
   0x1   :  { %172 = vset.pattern.permute.xlu1 %v175_v0  ;;  %171 = vset.pattern.permute.xlu0 %v175_v0  ;;  %v17_v1 = vld [vmem:[%s238_s1 + $0x10] sm:$0xff]  ;;  %v15_v2 = vld [vmem:[%s238_s1] sm:$0xff]  ;;  %v18_v3 = vld [vmem:[%s238_s1 + $0x18] sm:$0xff] }
   0x2   :  { %35 = vperm.xlu1 %172, %v17_v1   ;;  %25 = vperm.xlu0 %171, %v15_v2   ;;  %v16_v4 = vld [vmem:[%s238_s1 + $0x8] sm:$0xff]  ;;  %v173_v5 = vld [vmem:[%s239_s2] sm:$0xff]   ;;  %v21_v9 = vld [vmem:[%s240_s0 + $0x10] sm:$0xff] }
   0x3   :  { %162 = vmatprep.subr.bf16.mxu0 %v173_v5  ;;  %v174_v6 = vld [vmem:[%s239_s2 + $0x8] sm:$0xff]   ;;  %v19_v10 = vld [vmem:[%s240_s0] sm:$0xff]  ;;  %v22_v11 = vld [vmem:[%s240_s0 + $0x18] sm:$0xff] }
   0x4   :  { %163 = vmatpush3.bf16.msra.mxu0 %v173_v5  ;;  %v20_v12 = vld [vmem:[%s240_s0 + $0x8] sm:$0xff] }
   0x5   :  { %164 = vmatprep.subr.bf16.mxu0 %v174_v6 }
   0x6   :  { %40 = vperm.xlu1 %172, %v18_v3   ;;  %30 = vperm.xlu0 %171, %v16_v4  }
   0x8   :  { %165 = vmatpush3.bf16.msra.mxu0 %v174_v6 }
  0x81   :  { %v36_v7 = vpop.permute.xlu1 %35  ;;  %v26_v8 = vpop.permute.xlu0 %25 }
  0x82   :  { %v45_v15 = vmul.f32 %v36_v7, %v21_v9  ;;  %v43_v16 = vmul.f32 %v26_v8, %v19_v10 }
  0x85   :  { %v41_v13 = vpop.permute.xlu1 %40  ;;  %v31_v14 = vpop.permute.xlu0 %30 }
  0x86   :  { %v46_v17 = vmul.f32 %v41_v13, %v22_v11  ;;  %v44_v18 = vmul.f32 %v31_v14, %v20_v12 }
  0x88   :  { %v48_v19 = vpack.c.bf16 %v46_v17, %v45_v15  ;;  %v47_v20 = vpack.c.bf16 %v44_v18, %v43_v16 }
  0x8a   :  { %166 = vmatprep.mubr.msk.bf16.mxu0 %vm65_vm0, %v47_v20 }
  0x8b   :  { %167 = vmatmul.mubr.msk.bf16.vlgmr.msra.gmra.mrb[0].mxu0 %vm65_vm0, %v48_v19 }
 0x15e   :  { %v168_v21 = vpop.f32.mrb[0].mxu0 }
 0x15f   :  { %v156_v22 = vpack.c.bf16 %v168_v21, %v168_v21  ;;  %v106_v23 = vpop.f32.mrb[1].mxu0 }
 0x160   :  { %v154_v24 = vpack.c.bf16 %v106_v23, %v106_v23  ;;  %v169_v25 = vpop.f32.mrb[2].mxu0 }
 0x161   :  { %140 = vst.msk [vmem:[%s241_s3 + $0x8] sm:$0xf] %vm137_vm1, %v156_v22  ;;  %v157_v26 = vpack.c.bf16 %v169_v25, %v169_v25  ;;  %v109_v27 = vpop.f32.mrb[3].mxu0 }
 0x162   :  { %138 = vst.msk [vmem:[%s241_s3] sm:$0xf] %vm137_vm1, %v154_v24  ;;  %v155_v28 = vpack.c.bf16 %v109_v27, %v109_v27 }
 0x163   :  { %141 = vst.msk [vmem:[%s241_s3 + $0xc] sm:$0xf] %vm137_vm1, %v157_v26 }
 0x164   :  { %139 = vst.msk [vmem:[%s241_s3 + $0x4] sm:$0xf] %vm137_vm1, %v155_v28 }

// kernel: forward.6
= control target key start
LH: loop header
LB: loop body
LE: loop exit
PB: predicated region body
PF: predicated region fallthrough
CT: control target
= control target key end

     0   :  { %s765_s27 = smov 0   ;;  %s817_s0 = inlined_call_operand.vmem [shape: bf16[32,32], index: 0, kind: input, shape index: {}]   ;;  %s818_s1 = inlined_call_operand.vmem [shape: bf16[32,32], index: 1, kind: input, shape index: {}, may-alias: {1,2}]   ;;  %s819_s2 = inlined_call_operand.vmem [shape: bf16[32,32], index: 2, kind: input, shape index: {}, may-alias: {1,2}]   ;;  %s820_s3 = inlined_call_operand.vmem [shape: f32[32,1], index: 3, kind: input, shape index: {}]   ;;  %s821_s4 = inlined_call_operand.vmem [shape: f32[32,1], index: 4, kind: input, shape index: {}]   ;;  %s822_s5 = inlined_call_operand.vmem [shape: f32[1,32], index: 5, kind: input, shape index: {}]   ;;  %s823_s6 = inlined_call_operand.vmem [shape: f32[1,32], index: 6, kind: input, shape index: {}]   ;;  %s824_s7 = inlined_call_operand.vmem [shape: f32[32,32], index: 7, kind: output, shape index: {0}]   ;;  %s825_s8 = inlined_call_operand.vmem [shape: f32[32,1], index: 8, kind: output, shape index: {1}]  }
   0x1 LB: > { %s649_s28 = sadd.s32 4294967295, %s715_s27   ;;  %p653_p0 = scmp.ge.s32.totalorder %s715_s27, 1  ;;  %s715_s27 = sphi %s765_s27, %s19_s27  }
   0x2   : > { %p299_p1 = scmp.lt.s32.totalorder %s715_s27, 3 }
   0x4   : > { %p300_p2 = pnand %p653_p0, %p299_p1 }
   0x5   : > { %v702_v0 = vld [vmem:[%s818_s1] sm:$0xff] (!%p300_p2)   ;;  %v717_v1 = vmov (!%p300_p2), 0.0   ;;  %v703_v2 = vld [vmem:[%s818_s1 + $0x8] sm:$0xff] (!%p300_p2)   ;;  %vm718_vm0 = vmmov (!%p300_p2), 0   ;;  %s654_s11 = sshll.u32 (!%p300_p2), %s649_s28, 1  ;;  %v719_v3 = vmov (!%p300_p2), 0  }
   0x6   : > { %303 = sbr.rel (%p300_p2) target bundleno = 398 (0x18e), region = 48  ;;  %681 = vmatprep.subr.bf16.mxu0 (!%p300_p2), %v717_v1  ;;  %685 = vmatprep.mubr.msk.bf16.mxu0 (!%p300_p2), %vm718_vm0, %v717_v1  ;;  %p354_p3 = scmp.lt.s32.totalorder (!%p300_p2), %s654_s11, 3  ;;  %vm419_vm1 = vcmask (!%p300_p2), 261120   ;;  %v670_v16 = vld [vmem:[%s822_s5] ss:$0 sm:$0xff] (!%p300_p2)  ;;  %vm520_vm2 = vcmask (!%p300_p2), 7168  }
   0x7   : > { %682 = vmatpush3.bf16.msra.mxu0 (!%p300_p2), %v702_v0  ;;  %700 = vset.pattern.permute.xlu0 (!%p300_p2), %v719_v3  ;;  %v671_v27 = vld [vmem:[%s823_s6] ss:$0 sm:$0xff] (!%p300_p2) }
   0x8   : > { %683 = vmatprep.subr.bf16.mxu0 (!%p300_p2), %v717_v1  ;;  %701 = vset.pattern.permute.xlu1 (!%p300_p2), %v719_v3 }
   0xb   : > { %684 = vmatpush3.bf16.msra.mxu0 (!%p300_p2), %v703_v2 }
   0xd   : > { %s827_s11 = smov (!%p354_p3, %s654_s11), 3 }
   0xe   : > { %s655_s12 = sshll.u32 %s827_s11, 2  ;;  %s779_s13 = sshll.u32 %s827_s11, 3 }
   0xf   : > { %s357_s16 = scalar_lea.vmem %s817_s0, %s655_s12  ;;  %s369_s19 = scalar_lea.vmem %s820_s3, %s779_s13 }
  0x10   : > { %v704_v4 = vld [vmem:[%s357_s16] sm:$0xff]   ;;  %s375_s22 = scalar_lea.vmem %s821_s4, %s779_s13  ;;  %v397_v7 = vld [vmem:[%s369_s19 + $0x8] sm:$0xff]  ;;  %s363_s25 = scalar_lea.vmem %s819_s2, %s655_s12 }
  0x11   : > { %v396_v5 = vld [vmem:[%s369_s19] sm:$0xff]  ;;  %686 = vmatmul.mubr.msk.bf16.vlgmr.msra.gmra.mrb[0].mxu0 %vm419_vm1, %v704_v4  ;;  %v488_v8 = vld [vmem:[%s375_s22 + $0x8] sm:$0xff]  ;;  %s381_s9 = scalar_lea.vmem %s824_s7, %s779_s13  ;;  %s387_s15 = scalar_lea.vmem %s825_s8, %s779_s13 }
  0x12   : > { %v487_v6 = vld [vmem:[%s375_s22] sm:$0xff]  ;;  %466 = vperm.xlu0 %700, %v396_v5  }
  0x13   : > { %491 = vperm.xlu1 %701, %v487_v6   ;;  %v675_v9 = vld [vmem:[%s363_s25] sm:$0xff]  }
  0x14   : > { %v676_v10 = vunpack.c.l.bf16 %v675_v9  ;;  %v677_v12 = vunpack.c.h.bf16 %v675_v9 }
  0x16   : > { %471 = vperm.xlu0 %700, %v397_v7  }
  0x17   : > { %496 = vperm.xlu1 %701, %v488_v8  }
  0x91   : > { %v467_v11 = vpop.permute.xlu0 %466 }
  0x92   : > { %v492_v22 = vpop.permute.xlu1 %491 }
  0x95   : > { %v472_v21 = vpop.permute.xlu0 %471 }
  0x96   : > { %v497_v30 = vpop.permute.xlu1 %496 }
  0xe4   : > { %v457_v13 = vpop.f32.mrb[0].mxu0 }
  0xe5   : > { %v458_v14 = vadd.f32 %v676_v10, %v457_v13  ;;  %v687_v15 = vpop.f32.mrb[1].mxu0 }
  0xe6   : > { %v460_v17 = vpop.f32.mrb[2].mxu0 }
  0xe7   : > { %v474_v18 = vmul.f32 %v467_v11, %v458_v14  ;;  %v461_v19 = vadd.f32 %v677_v12, %v460_v17  ;;  %v688_v20 = vpop.f32.mrb[3].mxu0 }
  0xe9   : > { %v483_v23 = vadd.f32 %v670_v16, %v474_v18  ;;  %v475_v24 = vmul.f32 %v472_v21, %v461_v19 }
  0xeb   : > { %v485_v25 = vmax.f32 %v483_v23, 0.0  ;;  %v484_v26 = vadd.f32 %v670_v16, %v475_v24 }
  0xed   : > { %v499_v28 = vmul.f32 %v492_v22, %v485_v25  ;;  %v486_v29 = vmax.f32 %v484_v26, 0.0 }
  0xef   : > { %501 = vst.msk [vmem:[%s381_s9] sm:$0xff] %vm419_vm1, %v499_v28  ;;  %v500_v31 = vmul.f32 %v497_v30, %v486_v29  ;;  %v510_v32 = vmul.f32 %v671_v27, %v499_v28 }
  0xf1   : > { %502 = vst.msk [vmem:[%s381_s9 + $0x8] sm:$0xff] %vm419_vm1, %v500_v31  ;;  %v512_v33 = vsel %vm419_vm1, %v510_v32, 0.0  ;;  %v511_v34 = vmul.f32 %v671_v27, %v500_v31 }
  0xf2   : > { %513 = vadd.xlane.f32.xlu0 %v512_v33 }
  0xf3   : > { %v515_v35 = vsel %vm419_vm1, %v511_v34, 0.0 }
  0xf4   : > { %516 = vadd.xlane.f32.xlu1 %v515_v35 }
 0x17f   : > { %v514_v36 = vpop.xlane.xlu0 %513 }
 0x180   : > { %705 = vtanh.f32 %v514_v36 }
 0x181   : > { %v517_v37 = vpop.xlane.xlu1 %516 }
 0x182   : > { %707 = vtanh.f32 %v517_v37 }
 0x18a   : > { %v706_v38 = vpop.eup %705 }
 0x18b   : > { %521 = vst.msk [vmem:[%s387_s15] sm:$0xff] %vm520_vm2, %v706_v38 }
 0x18c   : > { %v708_v39 = vpop.eup %707 }
 0x18d   : > { %522 = vst.msk [vmem:[%s387_s15 + $0x8] sm:$0xff] %vm520_vm2, %v708_v39 }
 0x18e PF: > { %s19_s27 = sadd.s32 1, %s715_s27  }
 0x18f   : > { %p16_p4 = scmp.ge.s32.totalorder %s19_s27, 4  }
 0x191   :  { %18 = sbr.rel (!%p16_p4) target bundleno = 1 (0x1), region = 99 }

// kernel: forward.7
= control target key start
LH: loop header
LB: loop body
LE: loop exit
PB: predicated region body
PF: predicated region fallthrough
CT: control target
= control target key end

     0   :  { %v468_v0 = vmov 0   ;;  %v469_v9 = vmov 0.0   ;;  %vm108_vm0 = vcmask 261120   ;;  %vm470_vm1 = vmmov 0   ;;  %s675_s1 = inlined_call_operand.vmem [shape: f32[32,1], index: 1, kind: input, shape index: {}]   ;;  %s676_s2 = inlined_call_operand.vmem [shape: f32[32,1], index: 2, kind: input, shape index: {}]   ;;  %s677_s5 = inlined_call_operand.<no memory space> [shape: f32[1,1], index: 5, kind: input, shape index: {}]   ;;  %s678_s0 = inlined_call_operand.vmem [shape: f32[32,32], index: 0, kind: input, shape index: {}]   ;;  %s679_s4 = inlined_call_operand.vmem [shape: f32[1,32], index: 4, kind: input, shape index: {}]   ;;  %s680_s7 = inlined_call_operand.vmem [shape: f32[32,1], index: 7, kind: input, shape index: {}]   ;;  %s681_s8 = inlined_call_operand.vmem [shape: bf16[32,32], index: 8, kind: input, shape index: {}]   ;;  %s682_s3 = inlined_call_operand.vmem [shape: f32[32,8], index: 3, kind: input, shape index: {}]   ;;  %s683_s10 = inlined_call_operand.vmem [shape: bf16[32,32], index: 10, kind: output, shape index: {1}]   ;;  %s684_s6 = inlined_call_operand.vmem [shape: f32[8,32], index: 6, kind: input, shape index: {}, may-alias: {6,9}]   ;;  %s685_s9 = inlined_call_operand.vmem [shape: f32[8,32], index: 9, kind: output, shape index: {0}, may-alias: {6,9}]  }
   0x1   :  { %455 = vset.pattern.permute.xlu1 %v468_v0  ;;  %454 = vset.pattern.permute.xlu0 %v468_v0  ;;  %v47_v1 = vld [vmem:[%s675_s1 + $0x10] sm:$0xff]  ;;  %v45_v2 = vld [vmem:[%s675_s1] sm:$0xff]  ;;  %v48_v3 = vld [vmem:[%s675_s1 + $0x18] sm:$0xff]  ;;  %v16_v10 = vstv %s677_s5  ;;  %vm168_vm2 = vcmask 64512   ;;  %vm400_vm7 = vcmask 257024  }
   0x2   :  { %61 = vperm.xlu1 %455, %v47_v1   ;;  %51 = vperm.xlu0 %454, %v45_v2   ;;  %v46_v4 = vld [vmem:[%s675_s1 + $0x8] sm:$0xff]  ;;  %v37_v6 = vld [vmem:[%s676_s2] sm:$0xff]  ;;  %v40_v7 = vld [vmem:[%s676_s2 + $0x18] sm:$0xff]  ;;  %17 = vst [vmem:[#allocation2] sm:$0x1] %v16_v10 }
   0x3   :  { %v38_v5 = vld [vmem:[%s676_s2 + $0x8] sm:$0xff]  ;;  %v39_v8 = vld [vmem:[%s676_s2 + $0x10] sm:$0xff]  ;;  %435 = vmatprep.subr.bf16.mxu0 %v469_v9  ;;  %v41_v13 = vld [vmem:[%s678_s0] sm:$0xff]  ;;  %439 = vmatprep.mubr.msk.bf16.mxu0 %vm470_vm1, %v469_v9 }
   0x4   :  { %v42_v16 = vld [vmem:[%s678_s0 + $0x8] sm:$0xff]  ;;  %v43_v17 = vld [vmem:[%s678_s0 + $0x10] sm:$0xff]  ;;  %v44_v20 = vld [vmem:[%s678_s0 + $0x18] sm:$0xff] }
   0x5   :  { %v413_v23 = vld [vmem:[%s679_s4] ss:$0 sm:$0xff]  ;;  %v285_v51 = vld [vmem:[%s680_s7 + $0x10] sm:$0xff]  ;;  %v284_v53 = vld [vmem:[%s680_s7 + $0x8] sm:$0xff] }
   0x6   :  { %66 = vperm.xlu1 %455, %v48_v3   ;;  %56 = vperm.xlu0 %454, %v46_v4   ;;  %v283_v48 = vld [vmem:[%s680_s7] sm:$0xff]  ;;  %v286_v54 = vld [vmem:[%s680_s7 + $0x18] sm:$0xff]  ;;  %v457_v56 = vld [vmem:[%s681_s8 + $0x8] sm:$0xff]  }
   0x7   :  { %v456_v55 = vld [vmem:[%s681_s8] sm:$0xff]   ;;  %v133_v57 = vld [vmem:[%s682_s3 + $0x8] sm:$0xff]  ;;  %v134_v61 = vld [vmem:[%s682_s3 + $0x10] sm:$0xff] }
   0x8   :  { %443 = vmatprep.subr.bf16.mxu1 %v456_v55  ;;  %v132_v58 = vld [vmem:[%s682_s3] sm:$0xff]  ;;  %v135_v0 = vld [vmem:[%s682_s3 + $0x18] sm:$0xff] }
   0x9   :  { %v414_v42 = vld [vmem:[#allocation2] ss:$0 sm:$0xff]  ;;  %444 = vmatpush3.bf16.msra.mxu1 %v456_v55 }
   0xa   :  { %80 = vperm.xlu1 %455, %v38_v5   ;;  %75 = vperm.xlu0 %454, %v37_v6  }
   0xb   :  { %445 = vmatprep.subr.bf16.mxu1 %v457_v56 }
   0xd   :  { %446 = vmatpush3.bf16.msra.mxu1 %v457_v56 }
   0xe   :  { %90 = vperm.xlu1 %455, %v40_v7   ;;  %85 = vperm.xlu0 %454, %v39_v8  }
  0x81   :  { %v62_v11 = vpop.permute.xlu1 %61  ;;  %v52_v12 = vpop.permute.xlu0 %51 }
  0x82   :  { %v69_v18 = vmul.f32 %v52_v12, %v41_v13  ;;  %v71_v26 = vmul.f32 %v62_v11, %v43_v17 }
  0x85   :  { %v67_v14 = vpop.permute.xlu1 %66  ;;  %v57_v15 = vpop.permute.xlu0 %56 }
  0x86   :  { %v70_v19 = vmul.f32 %v57_v15, %v42_v16  ;;  %v72_v27 = vmul.f32 %v67_v14, %v44_v20 }
  0x89   :  { %v566_v21 = vpop.permute.xlu1 %80  ;;  %v568_v22 = vpop.permute.xlu0 %75 }
  0x8a   :  { %v574_v24 = vmul.f32 %v566_v21, %v70_v19  ;;  %v577_v25 = vmul.f32 %v568_v22, %v69_v18  ;;  %v137_v59 = vmul.f32 %v133_v57, %v566_v21  ;;  %v136_v60 = vmul.f32 %v132_v58, %v568_v22 }
  0x8c   :  { %v219_v28 = vpack.c.bf16 %v574_v24, %v577_v25  ;;  %v105_v29 = vmul.f32 %v413_v23, %v574_v24  ;;  %v104_v30 = vmul.f32 %v413_v23, %v577_v25  ;;  %vm140_vm3 = vcmp.gt.f32.partialorder %v136_v60, 0.5 }
  0x8d   :  { %v583_v31 = vpop.permute.xlu1 %90  ;;  %v86_v32 = vpop.permute.xlu0 %85  ;;  %vm141_vm4 = vcmp.gt.f32.partialorder %v137_v59, 0.5 }
  0x8e   :  { %v586_v33 = vmul.f32 %v583_v31, %v72_v27  ;;  %v588_v34 = vmul.f32 %v86_v32, %v71_v26  ;;  %436 = vmatpush3.bf16.msra.mxu0 %v219_v28  ;;  %v112_v35 = vsel %vm108_vm0, %v105_v29, 0.0  ;;  %v109_v36 = vsel %vm108_vm0, %v104_v30, 0.0 }
  0x8f   :  { %437 = vmatprep.subr.bf16.mxu0 %v469_v9  ;;  %113 = vadd.xlane.f32.xlu1 %v112_v35  ;;  %v138_v3 = vmul.f32 %v134_v61, %v86_v32  ;;  %v139_v7 = vmul.f32 %v135_v0, %v583_v31 }
  0x90   :  { %110 = vadd.xlane.f32.xlu0 %v109_v36  ;;  %v220_v37 = vpack.c.bf16 %v586_v33, %v588_v34  ;;  %v106_v38 = vmul.f32 %v413_v23, %v588_v34  ;;  %v107_v40 = vmul.f32 %v413_v23, %v586_v33 }
  0x91   :  { %vm142_vm5 = vcmp.gt.f32.partialorder %v138_v3, 0.5  ;;  %vm143_vm6 = vcmp.gt.f32.partialorder %v139_v7, 0.5 }
  0x92   :  { %438 = vmatpush3.bf16.msra.mxu0 %v220_v37  ;;  %v115_v39 = vsel %vm108_vm0, %v106_v38, 0.0  ;;  %v118_v41 = vsel %vm108_vm0, %v107_v40, 0.0 }
  0x94   :  { %116 = vadd.xlane.f32.xlu0 %v115_v39 }
  0x98   :  { %119 = vadd.xlane.f32.xlu0 %v118_v41 }
 0x11c   :  { %v114_v43 = vpop.xlane.xlu1 %113 }
 0x11d   :  { %v111_v44 = vpop.xlane.xlu0 %110  ;;  %v129_v45 = vadd.f32 %v414_v42, %v114_v43 }
 0x11e   :  { %v128_v46 = vadd.f32 %v414_v42, %v111_v44 }
 0x11f   :  { %151 = vperm.xlu0 %454, %v129_v45  }
 0x120   :  { %146 = vperm.xlu1 %455, %v128_v46  }
 0x121   :  { %v117_v47 = vpop.xlane.xlu0 %116 }
 0x122   :  { %v130_v49 = vadd.f32 %v414_v42, %v117_v47 }
 0x123   :  { %289 = vperm.xlu0 %454, %v283_v48  }
 0x124   :  { %156 = vperm.xlu1 %455, %v130_v49  }
 0x125   :  { %v120_v50 = vpop.xlane.xlu0 %119 }
 0x126   :  { %v131_v52 = vadd.f32 %v414_v42, %v120_v50 }
 0x127   :  { %299 = vperm.xlu0 %454, %v285_v51  }
 0x128   :  { %161 = vperm.xlu1 %455, %v131_v52  }
 0x12c   :  { %294 = vperm.xlu1 %455, %v284_v53  }
 0x130   :  { %304 = vperm.xlu1 %455, %v286_v54  }
 0x19e   :  { %v152_v63 = vpop.permute.xlu0 %151 }
 0x19f   :  { %v147_v62 = vpop.permute.xlu1 %146  ;;  %v165_v2 = vsel %vm141_vm4, %v152_v63, -1e+30 }
 0x1a0   :  { %v164_v1 = vsel %vm140_vm3, %v147_v62, -1e+30  ;;  %v170_v5 = vsel %vm168_vm2, %v165_v2, -inf }
 0x1a1   :  { %v169_v4 = vsel %vm168_vm2, %v164_v1, -inf }
 0x1a2   :  { %v173_v6 = vmax.f32 %v169_v4, %v170_v5  ;;  %v290_v10 = vpop.permute.xlu0 %289 }
 0x1a3   :  { %v157_v8 = vpop.permute.xlu1 %156  ;;  %v307_v17 = vmul.f32 %v290_v10, %v577_v25 }
 0x1a4   :  { %v166_v9 = vsel %vm142_vm5, %v157_v8, -1e+30 }
 0x1a5   :  { %v171_v13 = vsel %vm168_vm2, %v166_v9, -inf }
 0x1a6   :  { %v300_v20 = vpop.permute.xlu0 %299 }
 0x1a7   :  { %v162_v11 = vpop.permute.xlu1 %161  ;;  %v309_v27 = vmul.f32 %v300_v20, %v588_v34 }
 0x1a8   :  { %v167_v12 = vsel %vm143_vm6, %v162_v11, -1e+30 }
 0x1a9   :  { %v172_v14 = vsel %vm168_vm2, %v167_v12, -inf }
 0x1aa   :  { %v174_v15 = vmax.f32 %v171_v13, %v172_v14  ;;  %v280_v14 = vld [vmem:[%s684_s6] sm:$0xff] }
 0x1ab   :  { %v295_v16 = vpop.permute.xlu1 %294 }
 0x1ac   :  { %v175_v18 = vmax.f32 %v173_v6, %v174_v15  ;;  %v308_v19 = vmul.f32 %v295_v16, %v574_v24 }
 0x1ae   :  { %v176_v21 = vrot.slane %v175_v18, 4  ;;  %v311_v22 = vpack.c.bf16 %v308_v19, %v307_v17 }
 0x1af   :  { %v305_v23 = vpop.permute.xlu1 %304 }
 0x1b0   :  { %v177_v26 = vmax.f32 %v175_v18, %v176_v21  ;;  %v310_v28 = vmul.f32 %v305_v23, %v586_v33  ;;  %447 = vmatprep.mubr.msk.bf16.mxu1 %vm108_vm0, %v311_v22 }
 0x1b2   :  { %v178_v29 = vrot.slane %v177_v26, 2  ;;  %v312_v30 = vpack.c.bf16 %v310_v28, %v309_v27 }
 0x1b4   :  { %v179_v31 = vmax.f32 %v177_v26, %v178_v29  ;;  %448 = vmatmul.mubr.msk.bf16.vlgmr.msra.gmra.mrb[0].mxu1 %vm108_vm0, %v312_v30 }
 0x1b6   :  { %v180_v25 = vrot.slane %v179_v31, 1 }
 0x1b8   :  { %v181_v32 = vmax.f32 %v179_v31, %v180_v25 }
 0x1ba   :  { %v182_v35 = vsub.f32 %v164_v1, %v181_v32  ;;  %v183_v24 = vsub.f32 %v165_v2, %v181_v32  ;;  %v184_v36 = vsub.f32 %v166_v9, %v181_v32  ;;  %v185_v37 = vsub.f32 %v167_v12, %v181_v32 }
 0x1bc   :  { %v186_v38 = vmul.f32 1.442695, %v182_v35  ;;  %v188_v39 = vmul.f32 1.442695, %v183_v24  ;;  %v190_v40 = vmul.f32 1.442695, %v184_v36 }
 0x1bd   :  { %v192_v41 = vmul.f32 1.442695, %v185_v37 }
 0x1be   :  { %458 = vpow2.f32 %v186_v38 }
 0x1bf   :  { %460 = vpow2.f32 %v188_v39 }
 0x1c0   :  { %462 = vpow2.f32 %v190_v40 }
 0x1c1   :  { %464 = vpow2.f32 %v192_v41 }
 0x1c8   :  { %v459_v33 = vpop.eup %458 }
 0x1c9   :  { %v461_v34 = vpop.eup %460  ;;  %v194_v42 = vsel %vm140_vm3, %v459_v33, 0.0 }
 0x1ca   :  { %v463_v43 = vpop.eup %462  ;;  %v195_v44 = vsel %vm141_vm4, %v461_v34, 0.0  ;;  %v198_v45 = vsel %vm168_vm2, %v194_v42, 0.0 }
 0x1cb   :  { %v465_v46 = vpop.eup %464  ;;  %v196_v47 = vsel %vm142_vm5, %v463_v43, 0.0  ;;  %v199_v48 = vsel %vm168_vm2, %v195_v44, 0.0 }
 0x1cc   :  { %v197_v49 = vsel %vm143_vm6, %v465_v46, 0.0  ;;  %v200_v50 = vadd.f32 %v199_v48, %v198_v45  ;;  %v201_v51 = vsel %vm168_vm2, %v196_v47, 0.0 }
 0x1cd   :  { %v203_v53 = vsel %vm168_vm2, %v197_v49, 0.0 }
 0x1ce   :  { %v202_v52 = vadd.f32 %v201_v51, %v200_v50 }
 0x1d0   :  { %v204_v54 = vadd.f32 %v203_v53, %v202_v52 }
 0x1d2   :  { %v205_v55 = vrot.slane %v204_v54, 4 }
 0x1d4   :  { %v206_v56 = vadd.f32 %v205_v55, %v204_v54 }
 0x1d6   :  { %v207_v57 = vrot.slane %v206_v56, 2 }
 0x1d8   :  { %v208_v58 = vadd.f32 %v207_v57, %v206_v56 }
 0x1da   :  { %v209_v59 = vrot.slane %v208_v58, 1 }
 0x1dc   :  { %v210_v60 = vadd.f32 %v209_v59, %v208_v58 }
 0x1de   :  { %v211_v61 = vmax.f32 %v210_v60, 1e-20 }
 0x1e0   :  { %466 = vrcp.f32 %v211_v61 }
 0x1ea   :  { %v467_v62 = vpop.eup %466 }
 0x1eb   :  { %v215_v63 = vmul.f32 %v467_v62, %v196_v47  ;;  %v216_v0 = vmul.f32 %v467_v62, %v197_v49  ;;  %v213_v1 = vmul.f32 %v467_v62, %v194_v42  ;;  %v214_v2 = vmul.f32 %v467_v62, %v195_v44 }
 0x1ed   :  { %v218_v3 = vpack.c.bf16 %v216_v0, %v215_v63  ;;  %v217_v4 = vpack.c.bf16 %v214_v2, %v213_v1 }
 0x1ef   :  { %221 = vxpose.xlu0.c.b16.start [1/2] (short) (narrow) %v217_v4, 16 }
 0x1f3   :  { %222 = vxpose.xlu0.c.b16.end [2/2] (short) (narrow) %v218_v3, 16 }
 0x255   :  { %v229_v5 = vpop.trf.xlu0 }
 0x256   :  { %440 = vmatmul.mubr.msk.bf16.vlgmr.msra.gmra.mrb[0].mxu0 %vm108_vm0, %v229_v5 }
 0x287   :  { %v449_v6 = vpop.f32.mrb[0].mxu1 }
 0x288   :  { %v426_v7 = vpack.c.bf16 %v449_v6, %v449_v6  ;;  %v369_v8 = vpop.f32.mrb[1].mxu1 }
 0x289   :  { %v424_v9 = vpack.c.bf16 %v369_v8, %v369_v8  ;;  %v450_v10 = vpop.f32.mrb[2].mxu1 }
 0x28a   :  { %403 = vst.msk [vmem:[%s683_s10 + $0x8] sm:$0xf] %vm400_vm7, %v426_v7  ;;  %v427_v11 = vpack.c.bf16 %v450_v10, %v450_v10  ;;  %v372_v12 = vpop.f32.mrb[3].mxu1 }
 0x28b   :  { %401 = vst.msk [vmem:[%s683_s10] sm:$0xf] %vm400_vm7, %v424_v9  ;;  %v425_v13 = vpack.c.bf16 %v372_v12, %v372_v12 }
 0x28c   :  { %404 = vst.msk [vmem:[%s683_s10 + $0xc] sm:$0xf] %vm400_vm7, %v427_v11 }
 0x28d   :  { %402 = vst.msk [vmem:[%s683_s10 + $0x4] sm:$0xf] %vm400_vm7, %v425_v13 }
 0x329   :  { %v274_v15 = vpop.f32.mrb[0].mxu0 }
 0x32a   :  { %v281_v16 = vadd.f32 %v280_v14, %v274_v15  ;;  %v441_v17 = vpop.f32.mrb[1].mxu0 }
 0x32b   :  { %v277_v18 = vpop.f32.mrb[2].mxu0 }
 0x32c   :  { %282 = vst.msk [vmem:[%s685_s9] sm:$0xff] %vm108_vm0, %v281_v16  ;;  %v442_v19 = vpop.f32.mrb[3].mxu0 }

// kernel: forward.9
= control target key start
LH: loop header
LB: loop body
LE: loop exit
PB: predicated region body
PF: predicated region fallthrough
CT: control target
= control target key end

     0   :  { %s710_s0 = inlined_call_operand.vmem [shape: f32[32,32], index: 0, kind: input, shape index: {}]   ;;  %s711_s1 = inlined_call_operand.vmem [shape: f32[32,1], index: 1, kind: input, shape index: {}]   ;;  %s712_s2 = inlined_call_operand.vmem [shape: f32[32,1], index: 2, kind: input, shape index: {}]   ;;  %s713_s3 = inlined_call_operand.vmem [shape: f32[32,8], index: 3, kind: input, shape index: {}]   ;;  %s714_s4 = inlined_call_operand.vmem [shape: f32[1,32], index: 4, kind: input, shape index: {}]   ;;  %s715_s5 = inlined_call_operand.<no memory space> [shape: f32[1,1], index: 5, kind: input, shape index: {}]   ;;  %s716_s6 = inlined_call_operand.vmem [shape: f32[8,32], index: 6, kind: input, shape index: {}, may-alias: {6,9}]   ;;  %s717_s7 = inlined_call_operand.vmem [shape: f32[32,1], index: 7, kind: input, shape index: {}]   ;;  %s718_s8 = inlined_call_operand.vmem [shape: bf16[32,32], index: 8, kind: input, shape index: {}]   ;;  %s719_s9 = inlined_call_operand.vmem [shape: f32[8,32], index: 9, kind: output, shape index: {0}, may-alias: {6,9}]   ;;  %s720_s10 = inlined_call_operand.hbm [shape: bf16[32,32], index: 10, kind: output, shape index: {1}]  }
   0x1   :  { %v16_v0 = vstv %s715_s5 }
   0x2   :  { %17 = vst [vmem:[#allocation2] sm:$0x1] %v16_v0 }
   0x3   :  { %v48_v1 = vld [vmem:[%s711_s1 + $0x10] sm:$0xff]  ;;  %v46_v2 = vld [vmem:[%s711_s1] sm:$0xff]  ;;  %v508_v3 = vmov 0   ;;  %v49_v4 = vld [vmem:[%s711_s1 + $0x18] sm:$0xff] }
   0x4   :  { %471 = vset.pattern.permute.xlu1 %v508_v3  ;;  %470 = vset.pattern.permute.xlu0 %v508_v3  ;;  %v47_v5 = vld [vmem:[%s711_s1 + $0x8] sm:$0xff] }
   0x5   :  { %62 = vperm.xlu1 %471, %v48_v1   ;;  %52 = vperm.xlu0 %470, %v46_v2  }
   0x6   :  { %18 = vsyncpa [#allocation4], 0  ;;  %v39_v6 = vld [vmem:[%s712_s2 + $0x8] sm:$0xff]  ;;  %v38_v7 = vld [vmem:[%s712_s2] sm:$0xff]  ;;  %v509_v10 = vmov 0.0   ;;  %vm109_vm0 = vcmask 261120  }
   0x7   :  { %v41_v8 = vld [vmem:[%s712_s2 + $0x18] sm:$0xff]  ;;  %v40_v9 = vld [vmem:[%s712_s2 + $0x10] sm:$0xff]  ;;  %448 = vmatprep.subr.bf16.mxu0 %v509_v10  ;;  %v42_v13 = vld [vmem:[%s710_s0] sm:$0xff]  ;;  %vm510_vm1 = vmmov 0   ;;  %vm169_vm2 = vcmask 64512   ;;  %vm401_vm7 = vcmask 257024  }
   0x8   :  { %v43_v16 = vld [vmem:[%s710_s0 + $0x8] sm:$0xff]  ;;  %v44_v17 = vld [vmem:[%s710_s0 + $0x10] sm:$0xff]  ;;  %v45_v20 = vld [vmem:[%s710_s0 + $0x18] sm:$0xff]  ;;  %452 = vmatprep.mubr.msk.bf16.mxu0 %vm510_vm1, %v509_v10 }
   0x9   :  { %67 = vperm.xlu1 %471, %v49_v4   ;;  %57 = vperm.xlu0 %470, %v47_v5   ;;  %v426_v23 = vld [vmem:[%s714_s4] ss:$0 sm:$0xff]  ;;  %v286_v51 = vld [vmem:[%s717_s7 + $0x10] sm:$0xff]  ;;  %v285_v53 = vld [vmem:[%s717_s7 + $0x8] sm:$0xff] }
   0xa   :  { %v427_v42 = vld [vmem:[#allocation2] ss:$0 sm:$0xff]  ;;  %v287_v54 = vld [vmem:[%s717_s7 + $0x18] sm:$0xff]  ;;  %v473_v56 = vld [vmem:[%s718_s8 + $0x8] sm:$0xff]  }
   0xb   :  { %v284_v48 = vld [vmem:[%s717_s7] sm:$0xff]  ;;  %v134_v57 = vld [vmem:[%s713_s3 + $0x8] sm:$0xff]  ;;  %v135_v61 = vld [vmem:[%s713_s3 + $0x10] sm:$0xff] }
   0xc   :  { %v472_v55 = vld [vmem:[%s718_s8] sm:$0xff]   ;;  %v136_v0 = vld [vmem:[%s713_s3 + $0x18] sm:$0xff] }
   0xd   :  { %81 = vperm.xlu1 %471, %v39_v6   ;;  %76 = vperm.xlu0 %470, %v38_v7   ;;  %v133_v58 = vld [vmem:[%s713_s3] sm:$0xff]  ;;  %s511_s3 = smov [#allocation3]  }
   0xe   :  { %456 = vmatprep.subr.bf16.mxu1 %v472_v55  ;;  %s413_s12 = sshll.u32 %s511_s3, 4  ;;  %s414_s12 = int_to_ptr.vmem [resolvable:$true] %s413_s12 }
   0xf   :  { %457 = vmatpush3.bf16.msra.mxu1 %v472_v55  ;;  %s484_s13 = scalar_lea.vmem %s414_s12, 256  ;;  %p489_p1 = scmp.lt.s32.totalorder %s414_s12, %s414_s12 }
  0x10   :  { %458 = vmatprep.subr.bf16.mxu1 %v473_v56  ;;  %p485_p0 = scmp.ne.s32.totalorder %s414_s12, %s484_s13  ;;  %p490_p2 = scmp.lt.s32.totalorder %s484_s13, %s484_s13 }
  0x11   :  { %91 = vperm.xlu1 %471, %v41_v8   ;;  %86 = vperm.xlu0 %470, %v40_v9  }
  0x12   :  { %p491_p3 = por %p490_p2, %p489_p1 }
  0x13   :  { %459 = vmatpush3.bf16.msra.mxu1 %v473_v56 }
  0x14   :  { %p492_p4 = pnand %p491_p3, %p485_p0 }
  0x84   :  { %v63_v11 = vpop.permute.xlu1 %62  ;;  %v53_v12 = vpop.permute.xlu0 %52 }
  0x85   :  { %v70_v18 = vmul.f32 %v53_v12, %v42_v13  ;;  %v72_v26 = vmul.f32 %v63_v11, %v44_v17 }
  0x88   :  { %v68_v14 = vpop.permute.xlu1 %67  ;;  %v58_v15 = vpop.permute.xlu0 %57 }
  0x89   :  { %v71_v19 = vmul.f32 %v58_v15, %v43_v16  ;;  %v73_v27 = vmul.f32 %v68_v14, %v45_v20 }
  0x8c   :  { %v82_v21 = vpop.permute.xlu1 %81  ;;  %v77_v22 = vpop.permute.xlu0 %76 }
  0x8d   :  { %v612_v24 = vmul.f32 %v82_v21, %v71_v19  ;;  %v614_v25 = vmul.f32 %v77_v22, %v70_v18  ;;  %v138_v59 = vmul.f32 %v134_v57, %v82_v21  ;;  %v137_v60 = vmul.f32 %v133_v58, %v77_v22 }
  0x8f   :  { %v220_v28 = vpack.c.bf16 %v612_v24, %v614_v25  ;;  %v106_v29 = vmul.f32 %v426_v23, %v612_v24  ;;  %v105_v30 = vmul.f32 %v426_v23, %v614_v25  ;;  %vm141_vm3 = vcmp.gt.f32.partialorder %v137_v60, 0.5 }
  0x90   :  { %v620_v31 = vpop.permute.xlu1 %91  ;;  %v87_v32 = vpop.permute.xlu0 %86  ;;  %vm142_vm4 = vcmp.gt.f32.partialorder %v138_v59, 0.5 }
  0x91   :  { %v623_v33 = vmul.f32 %v620_v31, %v73_v27  ;;  %v625_v34 = vmul.f32 %v87_v32, %v72_v26  ;;  %449 = vmatpush3.bf16.msra.mxu0 %v220_v28  ;;  %v113_v35 = vsel %vm109_vm0, %v106_v29, 0.0  ;;  %v110_v36 = vsel %vm109_vm0, %v105_v30, 0.0 }
  0x92   :  { %450 = vmatprep.subr.bf16.mxu0 %v509_v10  ;;  %114 = vadd.xlane.f32.xlu1 %v113_v35  ;;  %v139_v3 = vmul.f32 %v135_v61, %v87_v32  ;;  %v140_v7 = vmul.f32 %v136_v0, %v620_v31 }
  0x93   :  { %111 = vadd.xlane.f32.xlu0 %v110_v36  ;;  %v221_v37 = vpack.c.bf16 %v623_v33, %v625_v34  ;;  %v107_v38 = vmul.f32 %v426_v23, %v625_v34  ;;  %v108_v40 = vmul.f32 %v426_v23, %v623_v33 }
  0x94   :  { %vm143_vm5 = vcmp.gt.f32.partialorder %v139_v3, 0.5  ;;  %vm144_vm6 = vcmp.gt.f32.partialorder %v140_v7, 0.5 }
  0x95   :  { %451 = vmatpush3.bf16.msra.mxu0 %v221_v37  ;;  %v116_v39 = vsel %vm109_vm0, %v107_v38, 0.0  ;;  %v119_v41 = vsel %vm109_vm0, %v108_v40, 0.0 }
  0x97   :  { %117 = vadd.xlane.f32.xlu0 %v116_v39 }
  0x9b   :  { %120 = vadd.xlane.f32.xlu0 %v119_v41 }
 0x11f   :  { %v115_v43 = vpop.xlane.xlu1 %114 }
 0x120   :  { %v112_v44 = vpop.xlane.xlu0 %111  ;;  %v130_v45 = vadd.f32 %v427_v42, %v115_v43 }
 0x121   :  { %v129_v46 = vadd.f32 %v427_v42, %v112_v44 }
 0x122   :  { %152 = vperm.xlu0 %470, %v130_v45  }
 0x123   :  { %147 = vperm.xlu1 %471, %v129_v46  }
 0x124   :  { %v118_v47 = vpop.xlane.xlu0 %117 }
 0x125   :  { %v131_v49 = vadd.f32 %v427_v42, %v118_v47 }
 0x126   :  { %290 = vperm.xlu0 %470, %v284_v48  }
 0x127   :  { %157 = vperm.xlu1 %471, %v131_v49  }
 0x128   :  { %v121_v50 = vpop.xlane.xlu0 %120 }
 0x129   :  { %v132_v52 = vadd.f32 %v427_v42, %v121_v50 }
 0x12a   :  { %300 = vperm.xlu0 %470, %v286_v51  }
 0x12b   :  { %162 = vperm.xlu1 %471, %v132_v52  }
 0x12f   :  { %295 = vperm.xlu1 %471, %v285_v53  }
 0x133   :  { %305 = vperm.xlu1 %471, %v287_v54  }
 0x1a1   :  { %v153_v63 = vpop.permute.xlu0 %152 }
 0x1a2   :  { %v148_v62 = vpop.permute.xlu1 %147  ;;  %v166_v2 = vsel %vm142_vm4, %v153_v63, -1e+30 }
 0x1a3   :  { %v165_v1 = vsel %vm141_vm3, %v148_v62, -1e+30  ;;  %v171_v5 = vsel %vm169_vm2, %v166_v2, -inf }
 0x1a4   :  { %v170_v4 = vsel %vm169_vm2, %v165_v1, -inf }
 0x1a5   :  { %v174_v6 = vmax.f32 %v170_v4, %v171_v5  ;;  %v291_v10 = vpop.permute.xlu0 %290 }
 0x1a6   :  { %v158_v8 = vpop.permute.xlu1 %157  ;;  %v308_v17 = vmul.f32 %v291_v10, %v614_v25 }
 0x1a7   :  { %v167_v9 = vsel %vm143_vm5, %v158_v8, -1e+30 }
 0x1a8   :  { %v172_v13 = vsel %vm169_vm2, %v167_v9, -inf }
 0x1a9   :  { %v301_v20 = vpop.permute.xlu0 %300 }
 0x1aa   :  { %v163_v11 = vpop.permute.xlu1 %162  ;;  %v310_v27 = vmul.f32 %v301_v20, %v625_v34 }
 0x1ab   :  { %v168_v12 = vsel %vm144_vm6, %v163_v11, -1e+30 }
 0x1ac   :  { %v173_v14 = vsel %vm169_vm2, %v168_v12, -inf }
 0x1ad   :  { %v175_v15 = vmax.f32 %v172_v13, %v173_v14 }
 0x1ae   :  { %v296_v16 = vpop.permute.xlu1 %295 }
 0x1af   :  { %v176_v18 = vmax.f32 %v174_v6, %v175_v15  ;;  %v309_v19 = vmul.f32 %v296_v16, %v612_v24 }
 0x1b1   :  { %v177_v21 = vrot.slane %v176_v18, 4  ;;  %v312_v22 = vpack.c.bf16 %v309_v19, %v308_v17 }
 0x1b2   :  { %v306_v23 = vpop.permute.xlu1 %305 }
 0x1b3   :  { %v178_v26 = vmax.f32 %v176_v18, %v177_v21  ;;  %v311_v28 = vmul.f32 %v306_v23, %v623_v33  ;;  %460 = vmatprep.mubr.msk.bf16.mxu1 %vm109_vm0, %v312_v22 }
 0x1b5   :  { %v179_v29 = vrot.slane %v178_v26, 2  ;;  %v313_v30 = vpack.c.bf16 %v311_v28, %v310_v27 }
 0x1b7   :  { %v180_v31 = vmax.f32 %v178_v26, %v179_v29  ;;  %461 = vmatmul.mubr.msk.bf16.vlgmr.msra.gmra.mrb[0].mxu1 %vm109_vm0, %v313_v30 }
 0x1b9   :  { %v181_v25 = vrot.slane %v180_v31, 1 }
 0x1bb   :  { %v182_v32 = vmax.f32 %v180_v31, %v181_v25 }
 0x1bd   :  { %v183_v35 = vsub.f32 %v165_v1, %v182_v32  ;;  %v184_v24 = vsub.f32 %v166_v2, %v182_v32  ;;  %v185_v36 = vsub.f32 %v167_v9, %v182_v32  ;;  %v186_v37 = vsub.f32 %v168_v12, %v182_v32 }
 0x1bf   :  { %v187_v38 = vmul.f32 1.442695, %v183_v35  ;;  %v189_v39 = vmul.f32 1.442695, %v184_v24  ;;  %v191_v40 = vmul.f32 1.442695, %v185_v36 }
 0x1c0   :  { %v193_v41 = vmul.f32 1.442695, %v186_v37 }
 0x1c1   :  { %474 = vpow2.f32 %v187_v38 }
 0x1c2   :  { %476 = vpow2.f32 %v189_v39 }
 0x1c3   :  { %478 = vpow2.f32 %v191_v40 }
 0x1c4   :  { %480 = vpow2.f32 %v193_v41 }
 0x1cb   :  { %v475_v33 = vpop.eup %474 }
 0x1cc   :  { %v477_v34 = vpop.eup %476  ;;  %v195_v42 = vsel %vm141_vm3, %v475_v33, 0.0 }
 0x1cd   :  { %v479_v43 = vpop.eup %478  ;;  %v196_v44 = vsel %vm142_vm4, %v477_v34, 0.0  ;;  %v199_v45 = vsel %vm169_vm2, %v195_v42, 0.0 }
 0x1ce   :  { %v481_v46 = vpop.eup %480  ;;  %v197_v47 = vsel %vm143_vm5, %v479_v43, 0.0  ;;  %v200_v48 = vsel %vm169_vm2, %v196_v44, 0.0 }
 0x1cf   :  { %v198_v49 = vsel %vm144_vm6, %v481_v46, 0.0  ;;  %v201_v50 = vadd.f32 %v200_v48, %v199_v45  ;;  %v202_v51 = vsel %vm169_vm2, %v197_v47, 0.0 }
 0x1d0   :  { %v204_v53 = vsel %vm169_vm2, %v198_v49, 0.0 }
 0x1d1   :  { %v203_v52 = vadd.f32 %v202_v51, %v201_v50 }
 0x1d3   :  { %v205_v54 = vadd.f32 %v204_v53, %v203_v52 }
 0x1d5   :  { %v206_v55 = vrot.slane %v205_v54, 4 }
 0x1d7   :  { %v207_v56 = vadd.f32 %v206_v55, %v205_v54 }
 0x1d9   :  { %v208_v57 = vrot.slane %v207_v56, 2 }
 0x1db   :  { %v209_v58 = vadd.f32 %v208_v57, %v207_v56 }
 0x1dd   :  { %v210_v59 = vrot.slane %v209_v58, 1 }
 0x1df   :  { %v211_v60 = vadd.f32 %v210_v59, %v209_v58 }
 0x1e1   :  { %v212_v61 = vmax.f32 %v211_v60, 1e-20 }
 0x1e3   :  { %482 = vrcp.f32 %v212_v61 }
 0x1ed   :  { %v483_v62 = vpop.eup %482 }
 0x1ee   :  { %v216_v63 = vmul.f32 %v483_v62, %v197_v47  ;;  %v217_v0 = vmul.f32 %v483_v62, %v198_v49  ;;  %v214_v1 = vmul.f32 %v483_v62, %v195_v42  ;;  %v215_v2 = vmul.f32 %v483_v62, %v196_v44 }
 0x1f0   :  { %v219_v3 = vpack.c.bf16 %v217_v0, %v216_v63  ;;  %v218_v4 = vpack.c.bf16 %v215_v2, %v214_v1 }
 0x1f2   :  { %222 = vxpose.xlu0.c.b16.start [1/2] (short) (narrow) %v218_v4, 16 }
 0x1f6   :  { %223 = vxpose.xlu0.c.b16.end [2/2] (short) (narrow) %v219_v3, 16 }
 0x258   :  { %v230_v5 = vpop.trf.xlu0 }
 0x259   :  { %453 = vmatmul.mubr.msk.bf16.vlgmr.msra.gmra.mrb[0].mxu0 %vm109_vm0, %v230_v5 }
 0x28a   :  { %v462_v6 = vpop.f32.mrb[0].mxu1 }
 0x28b   :  { %v439_v7 = vpack.c.bf16 %v462_v6, %v462_v6  ;;  %v370_v8 = vpop.f32.mrb[1].mxu1 }
 0x28c   :  { %v437_v9 = vpack.c.bf16 %v370_v8, %v370_v8  ;;  %v463_v10 = vpop.f32.mrb[2].mxu1 }
 0x28d   :  { %404 = vst.msk [vmem:[#allocation3 + $0x8] sm:$0xf] %vm401_vm7, %v439_v7  ;;  %v440_v11 = vpack.c.bf16 %v463_v10, %v463_v10  ;;  %v373_v12 = vpop.f32.mrb[3].mxu1 }
 0x28e   :  { %402 = vst.msk [vmem:[#allocation3] sm:$0xf] %vm401_vm7, %v437_v9  ;;  %v438_v13 = vpack.c.bf16 %v373_v12, %v373_v12 }
 0x28f   :  { %405 = vst.msk [vmem:[#allocation3 + $0xc] sm:$0xf] %vm401_vm7, %v440_v11 }
 0x290   :  { %403 = vst.msk [vmem:[#allocation3 + $0x4] sm:$0xf] %vm401_vm7, %v438_v13 }
 0x291   :  { %495 = shalt.err (!%p492_p4)
}
 0x292   :  { %s496_s15 = scalar_lea.hbm %s720_s10, 256 }
 0x293   :  { %p497_p5 = scmp.ne.s32.totalorder %s720_s10, %s496_s15  ;;  %p500_p6 = scmp.lt.u32.totalorder %s496_s15, %s720_s10 }
 0x295   :  { %p502_p7 = pnand %p500_p6, %p497_p5 }
 0x297   :  { %505 = shalt.err (!%p502_p7)
}
 0x298   :  { %s512_s18 = smov 64   ;;  %s513_s19 = smov 4   ;;  %v281_v14 = vld [vmem:[%s716_s6] sm:$0xff] }
 0x299   :  { %419 = dma.vmem_to_hbm [thread:$0]  %s414_s12, 256, %s720_s10, [#allocation4], %s512_s18, %s512_s18, %s513_s19  }
 0x32c   :  { %v275_v15 = vpop.f32.mrb[0].mxu0 }
 0x32d   :  { %v282_v16 = vadd.f32 %v281_v14, %v275_v15  ;;  %v454_v17 = vpop.f32.mrb[1].mxu0 }
 0x32e   :  { %v278_v18 = vpop.f32.mrb[2].mxu0 }
 0x32f   :  { %283 = vst.msk [vmem:[%s719_s9] sm:$0xff] %vm109_vm0, %v282_v16  ;;  %v455_v19 = vpop.f32.mrb[3].mxu0 }
 0x330   :  { %506 = dma.done.wait [#allocation4], 256  }
 0x331   :  { %507 = vsyncadd [#allocation4], 4294967040 }
 0x332   :  { %425 = vsyncpa [#allocation4], 1 }

</bundles_post_ra>
